<compile_context>
chip_gen: v5e
topology: v5e:2x2
jax: 0.10.0
libtpu: 0.0.40
codegen_flags: <defaults>
</compile_context>

<pallas_src>
import math
import numpy as np

import jax
import jax.numpy as jnp
from jax import lax
from jax.experimental import pallas as pl
from jax.experimental.pallas import tpu as pltpu


# ----------------------------- host-side helpers -----------------------------
def _xpos_tables(hidden_dim, length):
    """RetNet_Pos sin/cos tables (pairwise-duplicated angles), f32 [L, hidden]."""
    base = 1.0 / (10000.0 ** np.linspace(0.0, 1.0, hidden_dim // 2))
    angle = np.repeat(base, 2)                              # [a0,a0,a1,a1,...]
    angles = np.arange(length, dtype=np.float64)[:, None] * angle[None, :]
    return np.sin(angles).astype(np.float32), np.cos(angles).astype(np.float32)


def _rotate_cols(W):
    """W @ R with R the rotate_every_two matrix: col 2i -> -W[:,2i+1], col 2i+1 -> W[:,2i]."""
    return jnp.stack([-W[:, 1::2], W[:, 0::2]], axis=-1).reshape(W.shape)


def _pick_tile(length, target, align):
    """Largest multiple of `align` that divides `length` and is <= target, else `length`."""
    if length <= target:
        return length
    t = (target // align) * align
    while t >= align:
        if length % t == 0:
            return t
        t -= align
    return length


def _round_up(x, m):
    return ((x + m - 1) // m) * m


def _vmem_capacity_bytes():
    try:
        return int(pltpu.get_tpu_info().vmem_capacity_bytes)
    except Exception:
        try:
            kind = jax.devices()[0].device_kind.lower()
        except Exception:
            kind = ""
        return 64 * 2**20 if ("v7" in kind or "7x" in kind) else 128 * 2**20


def _has_bf16_vpu():
    try:
        kind = jax.devices()[0].device_kind.lower()
    except Exception:
        return False
    return any(t in kind for t in ("v6", "v7", "7x"))


# ------------------------------- Pallas kernel --------------------------------
def _make_kernel(*, dk, tq, tk, log_gamma, delta_keep, cache_kv, emit_score,
                 bf16_vpu):
    f32 = jnp.float32
    bf16 = jnp.bfloat16

    def kernel(*refs):
        (xq_ref, xkv_ref, wq_ref, wkv_ref,
         sinq_ref, cosq_ref, sink_ref, cosk_ref,
         logrs_ref, dbase_ref) = refs[:10]
        vt_ref = refs[10]
        nxt = 11
        score_ref = None
        if emit_score:
            score_ref = refs[nxt]
            nxt += 1
        q_scr = refs[nxt]
        nxt += 1
        k_scr = v_scr = None
        if cache_kv:
            k_scr = refs[nxt]
            v_scr = refs[nxt + 1]

        qi = pl.program_id(2)
        ki = pl.program_id(3)

        def project_kv():
            # One wide bf16 MXU matmul -> [tk, 2dk+dv] = [K | rot2(K) | V].
            kv = jnp.dot(xkv_ref[...], wkv_ref[...], preferred_element_type=f32)
            k = kv[:, :dk]
            k2 = kv[:, dk:2 * dk]                            # rot2(k)
            v = kv[:, 2 * dk:]
            k_rot = k * cosk_ref[...] - k2 * sink_ref[...]   # conjugate XPos
            return k_rot.astype(bf16), v.astype(bf16)

        if cache_kv:
            # Project K/V for this kv tile once per (b,h) and cache in VMEM.
            @pl.when(qi == 0)
            def _():
                k_rot, v = project_kv()
                off = pl.multiple_of(ki * tk, tk)
                k_scr[pl.ds(off, tk), :] = k_rot
                v_scr[pl.ds(off, tk), :] = v

        # Q projection (+XPos rotation) once per q tile; also zero the vt block.
        @pl.when(ki == 0)
        def _():
            qq = jnp.dot(xq_ref[...], wq_ref[...], preferred_element_type=f32)
            q = qq[:, :dk]
            q2 = qq[:, dk:]                                  # rot2(q)
            q_scr[...] = (q * cosq_ref[...] + q2 * sinq_ref[...]).astype(bf16)
            vt_ref[...] = jnp.zeros(vt_ref.shape, vt_ref.dtype)

        # Tile skip: fully above the diagonal, or so far below it that the
        # decay provably underflows to exact 0 in f32 (gamma^delta * rowscale).
        causal_live = (qi * tq + (tq - 1)) >= (ki * tk)
        delta_min = qi * tq - (ki * tk + (tk - 1))
        live = jnp.logical_and(causal_live, delta_min <= delta_keep)

        @pl.when(live)
        def _():
            if cache_kv:
                off = pl.multiple_of(ki * tk, tk)
                k_tile = k_scr[pl.ds(off, tk), :]            # [tk, dk] bf16
                v_tile = v_scr[pl.ds(off, tk), :]            # [tk, dv] bf16
            else:
                k_tile, v_tile = project_kv()

            s = lax.dot_general(q_scr[...], k_tile,
                                (((1,), (1,)), ((), ())),
                                preferred_element_type=f32)  # [tq, tk] f32

            # Decay weights from resident delta table + scalar offset; one exp
            # fuses gamma^(n-m), 1/sqrt(dk) and both per-row D normalisations.
            off_f = (qi * tq - ki * tk).astype(f32)
            delta = dbase_ref[...] + off_f
            mask = delta >= 0.0
            arg = delta * log_gamma + logrs_ref[...]
            if bf16_vpu:
                w = jnp.exp(arg.astype(bf16))                # bf16 EUP (v6e/v7x)
                sw = jnp.where(mask, s.astype(bf16) * w, 0)
                sw_mx = sw
            else:
                w = jnp.where(mask, jnp.exp(arg), 0.0)       # f32 path (v5e)
                sw = s * w
                sw_mx = sw.astype(bf16)
            if emit_score:
                score_ref[...] = sw.astype(score_ref.dtype)
            vt_ref[...] += jnp.dot(sw_mx, v_tile, preferred_element_type=f32)

        if emit_score:
            @pl.when(jnp.logical_not(live))
            def _():
                score_ref[...] = jnp.zeros(score_ref.shape, score_ref.dtype)

    return kernel


# --------------------------------- wrapper ------------------------------------
def retention_forward(X, W_Q, W_K, W_V, gamma=0.1, *,
                      return_score=True, score_dtype=jnp.float32, cache_kv=None):
    B, H, L, Dh = X.shape
    Dk = W_Q.shape[1]
    Dv = W_V.shape[1]
    assert Dk == Dh, "XPos tables assume head_size == hidden_dim (module default)"
    assert Dk % 2 == 0
    assert gamma > 0.0

    # Lane-dense padded head dims (q/k/v/vt lane widths are multiples of 128).
    Dkp = _round_up(Dk, 128)
    Dvp = _round_up(Dv, 128)

    cap = _vmem_capacity_bytes()
    bf16_vpu = _has_bf16_vpu()

    # Square, lane-dense tiles; larger where VMEM allows (v5e/v6e: 128 MiB).
    tile_target = 512 if cap >= 96 * 2**20 else 256
    Tq = _pick_tile(L, tile_target, 128)
    Tk = Tq
    Nq, Nk = L // Tq, L // Tk

    # Host-side constants.
    sin_np, cos_np = _xpos_tables(Dh, L)
    if Dkp > Dk:
        pad = np.zeros((L, Dkp - Dk), np.float32)
        sin_np = np.concatenate([sin_np, pad], axis=1)
        cos_np = np.concatenate([cos_np, pad], axis=1)
    sin = jnp.asarray(sin_np)
    cos = jnp.asarray(cos_np)

    d = np.arange(L, dtype=np.float64)
    S = np.cumsum(gamma ** d)                      # S[n] = sum_{j<=n} gamma^j
    log_rscale = -(0.5 * np.log(S)
                   + np.log(np.maximum(np.sqrt(S), 1.0))
                   + 0.5 * math.log(Dk))
    logrs = jnp.asarray(log_rscale.astype(np.float32)[:, None])       # [L, 1]

    dbase = jnp.asarray(np.arange(Tq, dtype=np.float32)[:, None]
                        - np.arange(Tk, dtype=np.float32)[None, :])   # [Tq, Tk]

    log_gamma = float(math.log(gamma))
    delta_keep = 10**9 if log_gamma >= -1e-9 else int(120.0 / -log_gamma)

    def pad_cols(W, width):
        p = width - W.shape[1]
        if p == 0:
            return W
        return jnp.concatenate([W, jnp.zeros((W.shape[0], p), W.dtype)], axis=1)

    # Fused bf16 weights with rotate_every_two folded in: [Q|Q@R], [K|K@R|V].
    WQp = pad_cols(W_Q, Dkp)
    WKp = pad_cols(W_K, Dkp)
    WVp = pad_cols(W_V, Dvp)
    Wq_all = jnp.concatenate([WQp, _rotate_cols(WQp)], axis=1).astype(jnp.bfloat16)
    Wkv_all = jnp.concatenate([WKp, _rotate_cols(WKp), WVp], axis=1).astype(jnp.bfloat16)
    Xb = X.astype(jnp.bfloat16)

    score_bytes = np.dtype(score_dtype).itemsize

    def est_vmem(with_cache):
        blocks = (2 * Tq * Dh * 2 + 2 * Tk * Dh * 2                        # X tiles (bf16)
                  + 2 * Dh * 2 * Dkp * 2 + 2 * Dh * (2 * Dkp + Dvp) * 2    # weights (bf16)
                  + 4 * Tq * Dkp * 4 + 4 * Tk * Dkp * 4                    # sin/cos (f32)
                  + 2 * Tq * 128 * 4 + 2 * Tq * Tk * 4                     # logrs + delta
                  + 2 * Tq * Dvp * 4)                                      # vt out (f32)
        if return_score:
            blocks += 2 * Tq * Tk * score_bytes
        scratch = Tq * Dkp * 2 + (L * (Dkp + Dvp) * 2 if with_cache else 0)
        return blocks + scratch

    if cache_kv is None:
        cache_kv = est_vmem(True) <= int(0.55 * cap)
    vmem_limit = int(min(max(int(1.3 * est_vmem(cache_kv)), 32 * 2**20),
                         int(0.85 * cap)))

    kernel = _make_kernel(dk=Dkp, tq=Tq, tk=Tk, log_gamma=log_gamma,
                          delta_keep=delta_keep, cache_kv=cache_kv,
                          emit_score=return_score, bf16_vpu=bf16_vpu)

    if cache_kv:
        # kv-side blocks are only consumed at qi==0: pin their index to 0 for
        # qi>0 so the pipeline elides the redundant DMAs.
        def xkv_map(b, h, qi, ki):
            first = 1 - jnp.minimum(qi, 1)
            return (b, h, ki * first, 0)

        def skv_map(b, h, qi, ki):
            first = 1 - jnp.minimum(qi, 1)
            return (ki * first, 0)
    else:
        def xkv_map(b, h, qi, ki):
            return (b, h, ki, 0)

        def skv_map(b, h, qi, ki):
            return (ki, 0)

    out_shape = [jax.ShapeDtypeStruct((B, H, L, Dvp), jnp.float32)]
    out_specs = [pl.BlockSpec((None, None, Tq, Dvp),
                              lambda b, h, qi, ki: (b, h, qi, 0))]
    if return_score:
        out_shape.append(jax.ShapeDtypeStruct((B, H, L, L), score_dtype))
        out_specs.append(pl.BlockSpec((None, None, Tq, Tk),
                                      lambda b, h, qi, ki: (b, h, qi, ki)))

    scratch_shapes = [pltpu.VMEM((Tq, Dkp), jnp.bfloat16)]       # Q_rot (bf16)
    if cache_kv:
        scratch_shapes += [pltpu.VMEM((L, Dkp), jnp.bfloat16),   # K_rot cache
                           pltpu.VMEM((L, Dvp), jnp.bfloat16)]   # V cache

    # With the K/V cache the qi axis must run sequentially; without it qi is
    # independent and may be core-parallel (helps v7x's 2 TCs at small B*H).
    dims = ("parallel", "parallel",
            "arbitrary" if cache_kv else "parallel",
            "arbitrary")

    flops = int(B * H * (2 * L * Dh * 2 * Dkp
                         + 2 * L * Dh * (2 * Dkp + Dvp)
                         + 2 * L * L * Dkp + 2 * L * L * Dvp))
    transc = int(B * H * L * L)
    bytes_accessed = int(2 * 2 * B * H * L * Dh + 4 * B * H * L * Dvp
                         + (B * H * L * L * score_bytes if return_score else 0)
                         + 2 * Dh * (4 * Dkp + Dvp) + 4 * L * (2 * Dkp + 1)
                         + 4 * Tq * Tk)

    def build(single_buffer_consts):
        const_kw = dict(pipeline_mode=pl.Buffered(1)) if single_buffer_consts else {}
        in_specs = [
            pl.BlockSpec((None, None, Tq, Dh), lambda b, h, qi, ki: (b, h, qi, 0)),   # X (q rows)
            pl.BlockSpec((None, None, Tk, Dh), xkv_map),                              # X (kv rows)
            pl.BlockSpec((Dh, 2 * Dkp), lambda b, h, qi, ki: (0, 0), **const_kw),     # Wq_all
            pl.BlockSpec((Dh, 2 * Dkp + Dvp), lambda b, h, qi, ki: (0, 0), **const_kw),  # Wkv_all
            pl.BlockSpec((Tq, Dkp), lambda b, h, qi, ki: (qi, 0)),                    # sin (q)
            pl.BlockSpec((Tq, Dkp), lambda b, h, qi, ki: (qi, 0)),                    # cos (q)
            pl.BlockSpec((Tk, Dkp), skv_map),                                         # sin (kv)
            pl.BlockSpec((Tk, Dkp), skv_map),                                         # cos (kv)
            pl.BlockSpec((Tq, 1), lambda b, h, qi, ki: (qi, 0)),                      # log row scale
            pl.BlockSpec((Tq, Tk), lambda b, h, qi, ki: (0, 0), **const_kw),          # delta table
        ]
        return pl.pallas_call(
            kernel,
            out_shape=tuple(out_shape),
            grid_spec=pltpu.PrefetchScalarGridSpec(
                num_scalar_prefetch=0,
                grid=(B, H, Nq, Nk),
                in_specs=in_specs,
                out_specs=out_specs,
                scratch_shapes=scratch_shapes),
            compiler_params=pltpu.CompilerParams(
                dimension_semantics=dims,
                vmem_limit_bytes=vmem_limit),
            cost_estimate=pl.CostEstimate(flops=flops,
                                          transcendentals=transc,
                                          bytes_accessed=bytes_accessed),
        )

    args = (Xb, Xb, Wq_all, Wkv_all, sin, cos, sin, cos, logrs, dbase)
    try:
        outs = build(True)(*args)
    except Exception:
        # Fallback for jax versions without BlockSpec(pipeline_mode=...).
        outs = build(False)(*args)

    vt = outs[0][..., :Dv]
    score = outs[1] if return_score else None
    return vt, score


# ------------------------------ pure-JAX reference ----------------------------
def reference(X, W_Q, W_K, W_V, gamma):
    B, H, L, Dh = X.shape
    dk = W_Q.shape[1]
    sin_np, cos_np = _xpos_tables(Dh, L)
    sin = jnp.asarray(sin_np)
    cos = jnp.asarray(cos_np)

    def rot2(x):  # rotate_every_two
        x1 = x[..., 0::2]
        x2 = x[..., 1::2]
        return jnp.stack([-x2, x1], axis=-1).reshape(x.shape)

    q = X @ W_Q
    k = X @ W_K
    v = X @ W_V
    q = q * cos + rot2(q) * sin
    k = k * cos - rot2(k) * sin                       # conjugate XPos
    score = jnp.einsum("bhld,bhmd->bhlm", q, k) / math.sqrt(dk)

    n = np.arange(L)[:, None]
    m = np.arange(L)[None, :]
    D = np.where(n >= m, gamma ** np.maximum(n - m, 0).astype(np.float64), 0.0)
    D = D / np.sqrt(D.sum(axis=1, keepdims=True))                  # get_D row scaling
    norm = np.maximum(np.abs(D.sum(axis=1, keepdims=True)), 1.0)   # forward-loop norm
    Deff = jnp.asarray((D / norm).astype(np.float32))

    score = score * Deff
    vt = jnp.einsum("bhlm,bhmd->bhld", score, v)
    return vt, score


if __name__ == "__main__":
    # Small shapes consistent with the module (head_size=None -> hidden, double_v=True).
    B, H, L, hidden = 2, 2, 8, 32
    head_size = hidden
    v_dim = 2 * head_size
    gamma = 0.1

    key = jax.random.PRNGKey(0)
    kx, kq, kk, kv = jax.random.split(key, 4)

    X = jax.random.normal(kx, (B, H, L, hidden), dtype=jnp.float32)
    W_Q = jax.random.normal(kq, (hidden, head_size), dtype=jnp.float32) / hidden
    W_K = jax.random.normal(kk, (hidden, head_size), dtype=jnp.float32) / hidden
    W_V = jax.random.normal(kv, (hidden, v_dim), dtype=jnp.float32) / hidden

    # Default path: K/V VMEM cache + dense score output (module semantics).
    vt, score = retention_forward(X, W_Q, W_K, W_V, gamma)
    jax.block_until_ready((vt, score))

    vt_ref, score_ref = reference(X, W_Q, W_K, W_V, gamma)
    np.testing.assert_allclose(np.asarray(score), np.asarray(score_ref),
                               rtol=3e-2, atol=2e-3)
    np.testing.assert_allclose(np.asarray(vt), np.asarray(vt_ref),
                               rtol=3e-2, atol=2e-3)

    # Exercise the no-cache (per-tile K/V recompute) + vt-only fallback path
    # that large shapes on v7x (64 MiB VMEM) would take.
    vt2, _ = retention_forward(X, W_Q, W_K, W_V, gamma,
                               return_score=False, cache_kv=False)
    jax.block_until_ready(vt2)
    np.testing.assert_allclose(np.asarray(vt2), np.asarray(vt_ref),
                               rtol=3e-2, atol=2e-3)

    print("KERNEL_OK")
</pallas_src>

<mosaic_0001>
module attributes {stable_mosaic.version = 11 : i64} {
  func.func @kernel(%arg0: i32, %arg1: i32, %arg2: i32, %arg3: i32, %arg4: memref<1x1x8x32xbf16, #tpu.memory_space<vmem>>, %arg5: memref<1x1x8x32xbf16, #tpu.memory_space<vmem>>, %arg6: memref<32x256xbf16, #tpu.memory_space<vmem>>, %arg7: memref<32x384xbf16, #tpu.memory_space<vmem>>, %arg8: memref<8x128xf32, #tpu.memory_space<vmem>>, %arg9: memref<8x128xf32, #tpu.memory_space<vmem>>, %arg10: memref<8x128xf32, #tpu.memory_space<vmem>>, %arg11: memref<8x128xf32, #tpu.memory_space<vmem>>, %arg12: memref<8x1xf32, #tpu.memory_space<vmem>>, %arg13: memref<8x8xf32, #tpu.memory_space<vmem>>, %arg14: memref<1x1x8x128xf32, #tpu.memory_space<vmem>>, %arg15: memref<1x1x8x8xf32, #tpu.memory_space<vmem>>, %arg16: memref<8x128xbf16, #tpu.memory_space<vmem>>, %arg17: memref<8x128xbf16, #tpu.memory_space<vmem>>, %arg18: memref<8x128xbf16, #tpu.memory_space<vmem>>) attributes {dimension_semantics = [#tpu.dimension_semantics<parallel>, #tpu.dimension_semantics<parallel>, #tpu.dimension_semantics<arbitrary>, #tpu.dimension_semantics<arbitrary>], iteration_bounds = array<i64: 2, 2, 1, 1>, scalar_prefetch = 0 : i64, scratch_operands = 3 : i64, tpu.core_type = #tpu.core_type<tc>, window_params = [{transform_indices = @transform_0, window_bounds = array<i64: 1, 1, 8, 32>}, {transform_indices = @transform_1, window_bounds = array<i64: 1, 1, 8, 32>}, {pipeline_mode = #tpu.pipeline_mode<synchronous>, transform_indices = @transform_2, window_bounds = array<i64: 32, 256>}, {pipeline_mode = #tpu.pipeline_mode<synchronous>, transform_indices = @transform_3, window_bounds = array<i64: 32, 384>}, {transform_indices = @transform_4, window_bounds = array<i64: 8, 128>}, {transform_indices = @transform_5, window_bounds = array<i64: 8, 128>}, {transform_indices = @transform_6, window_bounds = array<i64: 8, 128>}, {transform_indices = @transform_7, window_bounds = array<i64: 8, 128>}, {transform_indices = @transform_8, window_bounds = array<i64: 8, 1>}, {pipeline_mode = #tpu.pipeline_mode<synchronous>, transform_indices = @transform_9, window_bounds = array<i64: 8, 8>}, {transform_indices = @transform_10, window_bounds = array<i64: 1, 1, 8, 128>}, {transform_indices = @transform_11, window_bounds = array<i64: 1, 1, 8, 8>}]} {
    %c0_i32 = arith.constant 0 : i32
    %0 = arith.cmpi eq, %arg2, %c0_i32 : i32
    %1 = arith.extui %0 : i1 to i32
    %c0_i32_0 = arith.constant 0 : i32
    %2 = arith.cmpi ne, %1, %c0_i32_0 : i32
    scf.if %2 {
      %c0 = arith.constant 0 : index
      %c0_9 = arith.constant 0 : index
      %c0_10 = arith.constant 0 : index
      %c0_11 = arith.constant 0 : index
      %21 = vector.load %arg5[%c0, %c0_9, %c0_10, %c0_11] : memref<1x1x8x32xbf16, #tpu.memory_space<vmem>>, vector<1x1x8x32xbf16>
      %22 = vector.shape_cast %21 : vector<1x1x8x32xbf16> to vector<8x32xbf16>
      %c0_12 = arith.constant 0 : index
      %c0_13 = arith.constant 0 : index
      %23 = vector.load %arg7[%c0_12, %c0_13] : memref<32x384xbf16, #tpu.memory_space<vmem>>, vector<32x384xbf16>
      %cst = arith.constant dense<0.000000e+00> : vector<8x384xf32>
      %24 = tpu.matmul %22, %23, %cst {dimension_numbers = #tpu.dot_dimension_numbers<[1], [0], [0], [1], [0, 0, 1, 1], [], []>} : vector<8x32xbf16>, vector<32x384xbf16>, vector<8x384xf32> -> vector<8x384xf32>
      %25 = vector.extract_strided_slice %24 {offsets = [0, 0], sizes = [8, 128], strides = [1, 1]} : vector<8x384xf32> to vector<8x128xf32>
      %26 = vector.extract_strided_slice %24 {offsets = [0, 128], sizes = [8, 128], strides = [1, 1]} : vector<8x384xf32> to vector<8x128xf32>
      %27 = vector.extract_strided_slice %24 {offsets = [0, 256], sizes = [8, 128], strides = [1, 1]} : vector<8x384xf32> to vector<8x128xf32>
      %c0_14 = arith.constant 0 : index
      %c0_15 = arith.constant 0 : index
      %28 = vector.load %arg11[%c0_14, %c0_15] : memref<8x128xf32, #tpu.memory_space<vmem>>, vector<8x128xf32>
      %29 = arith.mulf %25, %28 : vector<8x128xf32>
      %c0_16 = arith.constant 0 : index
      %c0_17 = arith.constant 0 : index
      %30 = vector.load %arg10[%c0_16, %c0_17] : memref<8x128xf32, #tpu.memory_space<vmem>>, vector<8x128xf32>
      %31 = arith.mulf %26, %30 : vector<8x128xf32>
      %32 = arith.subf %29, %31 : vector<8x128xf32>
      %33 = arith.truncf %32 : vector<8x128xf32> to vector<8x128xbf16>
      %34 = arith.truncf %27 : vector<8x128xf32> to vector<8x128xbf16>
      %c8_i32_18 = arith.constant 8 : i32
      %35 = arith.muli %arg3, %c8_i32_18 : i32
      %36 = tpu.assume_multiple %35, 8 : i32
      %37 = arith.index_cast %36 : i32 to index
      %c0_19 = arith.constant 0 : index
      %38 = vector.load %arg17[%37, %c0_19] : memref<8x128xbf16, #tpu.memory_space<vmem>>, vector<8x128xbf16>
      tpu.vector_store %arg17[%37, %c0_19], %33 {strides = array<i32>} : memref<8x128xbf16, #tpu.memory_space<vmem>>, vector<8x128xbf16>,
      %39 = arith.index_cast %36 : i32 to index
      %c0_20 = arith.constant 0 : index
      %40 = vector.load %arg18[%39, %c0_20] : memref<8x128xbf16, #tpu.memory_space<vmem>>, vector<8x128xbf16>
      tpu.vector_store %arg18[%39, %c0_20], %34 {strides = array<i32>} : memref<8x128xbf16, #tpu.memory_space<vmem>>, vector<8x128xbf16>,
    } else {
    }
    %c0_i32_1 = arith.constant 0 : i32
    %3 = arith.cmpi eq, %arg3, %c0_i32_1 : i32
    %4 = arith.extui %3 : i1 to i32
    %c0_i32_2 = arith.constant 0 : i32
    %5 = arith.cmpi ne, %4, %c0_i32_2 : i32
    scf.if %5 {
      %c0 = arith.constant 0 : index
      %c0_9 = arith.constant 0 : index
      %c0_10 = arith.constant 0 : index
      %c0_11 = arith.constant 0 : index
      %21 = vector.load %arg4[%c0, %c0_9, %c0_10, %c0_11] : memref<1x1x8x32xbf16, #tpu.memory_space<vmem>>, vector<1x1x8x32xbf16>
      %22 = vector.shape_cast %21 : vector<1x1x8x32xbf16> to vector<8x32xbf16>
      %c0_12 = arith.constant 0 : index
      %c0_13 = arith.constant 0 : index
      %23 = vector.load %arg6[%c0_12, %c0_13] : memref<32x256xbf16, #tpu.memory_space<vmem>>, vector<32x256xbf16>
      %cst = arith.constant dense<0.000000e+00> : vector<8x256xf32>
      %24 = tpu.matmul %22, %23, %cst {dimension_numbers = #tpu.dot_dimension_numbers<[1], [0], [0], [1], [0, 0, 1, 1], [], []>} : vector<8x32xbf16>, vector<32x256xbf16>, vector<8x256xf32> -> vector<8x256xf32>
      %25 = vector.extract_strided_slice %24 {offsets = [0, 0], sizes = [8, 128], strides = [1, 1]} : vector<8x256xf32> to vector<8x128xf32>
      %26 = vector.extract_strided_slice %24 {offsets = [0, 128], sizes = [8, 128], strides = [1, 1]} : vector<8x256xf32> to vector<8x128xf32>
      %c0_14 = arith.constant 0 : index
      %c0_15 = arith.constant 0 : index
      %27 = vector.load %arg9[%c0_14, %c0_15] : memref<8x128xf32, #tpu.memory_space<vmem>>, vector<8x128xf32>
      %28 = arith.mulf %25, %27 : vector<8x128xf32>
      %c0_16 = arith.constant 0 : index
      %c0_17 = arith.constant 0 : index
      %29 = vector.load %arg8[%c0_16, %c0_17] : memref<8x128xf32, #tpu.memory_space<vmem>>, vector<8x128xf32>
      %30 = arith.mulf %26, %29 : vector<8x128xf32>
      %31 = arith.addf %28, %30 : vector<8x128xf32>
      %32 = arith.truncf %31 : vector<8x128xf32> to vector<8x128xbf16>
      %c0_18 = arith.constant 0 : index
      %c0_19 = arith.constant 0 : index
      %33 = vector.load %arg16[%c0_18, %c0_19] : memref<8x128xbf16, #tpu.memory_space<vmem>>, vector<8x128xbf16>
      tpu.vector_store %arg16[%c0_18, %c0_19], %32 {strides = array<i32>} : memref<8x128xbf16, #tpu.memory_space<vmem>>, vector<8x128xbf16>,
      %cst_20 = arith.constant 0.000000e+00 : f32
      %34 = vector.broadcast %cst_20 : f32 to vector<8x128xf32>
      %c0_21 = arith.constant 0 : index
      %c0_22 = arith.constant 0 : index
      %c0_23 = arith.constant 0 : index
      %c0_24 = arith.constant 0 : index
      %35 = vector.load %arg14[%c0_21, %c0_22, %c0_23, %c0_24] : memref<1x1x8x128xf32, #tpu.memory_space<vmem>>, vector<1x1x8x128xf32>
      %36 = vector.shape_cast %35 : vector<1x1x8x128xf32> to vector<8x128xf32>
      %37 = vector.shape_cast %34 : vector<8x128xf32> to vector<1x1x8x128xf32>
      tpu.vector_store %arg14[%c0_21, %c0_22, %c0_23, %c0_24], %37 {strides = array<i32>} : memref<1x1x8x128xf32, #tpu.memory_space<vmem>>, vector<1x1x8x128xf32>,
    } else {
    }
    %c8_i32 = arith.constant 8 : i32
    %6 = arith.muli %arg2, %c8_i32 : i32
    %c7_i32 = arith.constant 7 : i32
    %7 = arith.addi %6, %c7_i32 : i32
    %c8_i32_3 = arith.constant 8 : i32
    %8 = arith.muli %arg3, %c8_i32_3 : i32
    %9 = arith.cmpi sge, %7, %8 : i32
    %c8_i32_4 = arith.constant 8 : i32
    %10 = arith.muli %arg2, %c8_i32_4 : i32
    %c8_i32_5 = arith.constant 8 : i32
    %11 = arith.muli %arg3, %c8_i32_5 : i32
    %c7_i32_6 = arith.constant 7 : i32
    %12 = arith.addi %11, %c7_i32_6 : i32
    %13 = arith.subi %10, %12 : i32
    %c52_i32 = arith.constant 52 : i32
    %14 = arith.cmpi sle, %13, %c52_i32 : i32
    %15 = arith.andi %9, %14 : i1
    %16 = arith.extui %15 : i1 to i32
    %c0_i32_7 = arith.constant 0 : i32
    %17 = arith.cmpi ne, %16, %c0_i32_7 : i32
    scf.if %17 {
      %c8_i32_9 = arith.constant 8 : i32
      %21 = arith.muli %arg3, %c8_i32_9 : i32
      %22 = tpu.assume_multiple %21, 8 : i32
      %23 = arith.index_cast %22 : i32 to index
      %c0 = arith.constant 0 : index
      %24 = vector.load %arg17[%23, %c0] : memref<8x128xbf16, #tpu.memory_space<vmem>>, vector<8x128xbf16>
      %25 = arith.index_cast %22 : i32 to index
      %c0_10 = arith.constant 0 : index
      %26 = vector.load %arg18[%25, %c0_10] : memref<8x128xbf16, #tpu.memory_space<vmem>>, vector<8x128xbf16>
      %c0_11 = arith.constant 0 : index
      %c0_12 = arith.constant 0 : index
      %27 = vector.load %arg16[%c0_11, %c0_12] : memref<8x128xbf16, #tpu.memory_space<vmem>>, vector<8x128xbf16>
      %cst = arith.constant dense<0.000000e+00> : vector<8x8xf32>
      %28 = tpu.matmul %27, %24, %cst {dimension_numbers = #tpu.dot_dimension_numbers<[1], [1], [0], [0], [0, 0, 1, 0], [], []>} : vector<8x128xbf16>, vector<8x128xbf16>, vector<8x8xf32> -> vector<8x8xf32>
      %c8_i32_13 = arith.constant 8 : i32
      %29 = arith.muli %arg2, %c8_i32_13 : i32
      %c8_i32_14 = arith.constant 8 : i32
      %30 = arith.muli %arg3, %c8_i32_14 : i32
      %31 = arith.subi %29, %30 : i32
      %32 = arith.sitofp %31 : i32 to f32
      %c0_15 = arith.constant 0 : index
      %c0_16 = arith.constant 0 : index
      %33 = vector.load %arg13[%c0_15, %c0_16] : memref<8x8xf32, #tpu.memory_space<vmem>>, vector<8x8xf32>
      %34 = vector.broadcast %32 : f32 to vector<8x8xf32>
      %35 = arith.addf %33, %34 : vector<8x8xf32>
      %cst_17 = arith.constant 0.000000e+00 : f32
      %36 = vector.broadcast %cst_17 : f32 to vector<8x8xf32>
      %37 = arith.cmpf oge, %35, %36 : vector<8x8xf32>
      %cst_18 = arith.constant -2.30258512 : f32
      %38 = vector.broadcast %cst_18 : f32 to vector<8x8xf32>
      %39 = arith.mulf %35, %38 : vector<8x8xf32>
      %c0_19 = arith.constant 0 : index
      %c0_20 = arith.constant 0 : index
      %40 = vector.load %arg12[%c0_19, %c0_20] : memref<8x1xf32, #tpu.memory_space<vmem>>, vector<8x1xf32>
      %41 = vector.broadcast %40 : vector<8x1xf32> to vector<8x8xf32>
      %42 = arith.addf %39, %41 : vector<8x8xf32>
      %43 = math.exp %42 : vector<8x8xf32>
      %cst_21 = arith.constant 0.000000e+00 : f32
      %44 = vector.broadcast %cst_21 : f32 to vector<8x8xf32>
      %45 = arith.select %37, %43, %44 : vector<8x8xi1>, vector<8x8xf32>
      %46 = arith.mulf %28, %45 : vector<8x8xf32>
      %47 = arith.truncf %46 : vector<8x8xf32> to vector<8x8xbf16>
      %c0_22 = arith.constant 0 : index
      %c0_23 = arith.constant 0 : index
      %c0_24 = arith.constant 0 : index
      %c0_25 = arith.constant 0 : index
      %48 = vector.load %arg15[%c0_22, %c0_23, %c0_24, %c0_25] : memref<1x1x8x8xf32, #tpu.memory_space<vmem>>, vector<1x1x8x8xf32>
      %49 = vector.shape_cast %48 : vector<1x1x8x8xf32> to vector<8x8xf32>
      %50 = vector.shape_cast %46 : vector<8x8xf32> to vector<1x1x8x8xf32>
      tpu.vector_store %arg15[%c0_22, %c0_23, %c0_24, %c0_25], %50 {strides = array<i32>} : memref<1x1x8x8xf32, #tpu.memory_space<vmem>>, vector<1x1x8x8xf32>,
      %c0_26 = arith.constant 0 : index
      %c0_27 = arith.constant 0 : index
      %c0_28 = arith.constant 0 : index
      %c0_29 = arith.constant 0 : index
      %51 = vector.load %arg14[%c0_26, %c0_27, %c0_28, %c0_29] : memref<1x1x8x128xf32, #tpu.memory_space<vmem>>, vector<1x1x8x128xf32>
      %52 = vector.shape_cast %51 : vector<1x1x8x128xf32> to vector<8x128xf32>
      %cst_30 = arith.constant dense<0.000000e+00> : vector<8x128xf32>
      %53 = tpu.matmul %47, %26, %cst_30 {dimension_numbers = #tpu.dot_dimension_numbers<[1], [0], [0], [1], [0, 0, 1, 1], [], []>} : vector<8x8xbf16>, vector<8x128xbf16>, vector<8x128xf32> -> vector<8x128xf32>
      %54 = arith.addf %52, %53 : vector<8x128xf32>
      %c0_31 = arith.constant 0 : index
      %c0_32 = arith.constant 0 : index
      %c0_33 = arith.constant 0 : index
      %c0_34 = arith.constant 0 : index
      %55 = vector.load %arg14[%c0_31, %c0_32, %c0_33, %c0_34] : memref<1x1x8x128xf32, #tpu.memory_space<vmem>>, vector<1x1x8x128xf32>
      %56 = vector.shape_cast %55 : vector<1x1x8x128xf32> to vector<8x128xf32>
      %57 = vector.shape_cast %54 : vector<8x128xf32> to vector<1x1x8x128xf32>
      tpu.vector_store %arg14[%c0_31, %c0_32, %c0_33, %c0_34], %57 {strides = array<i32>} : memref<1x1x8x128xf32, #tpu.memory_space<vmem>>, vector<1x1x8x128xf32>,
    } else {
    }
    %true = arith.constant true
    %18 = arith.xori %15, %true : i1
    %19 = arith.extui %18 : i1 to i32
    %c0_i32_8 = arith.constant 0 : i32
    %20 = arith.cmpi ne, %19, %c0_i32_8 : i32
    scf.if %20 {
      %cst = arith.constant 0.000000e+00 : f32
      %21 = vector.broadcast %cst : f32 to vector<8x8xf32>
      %c0 = arith.constant 0 : index
      %c0_9 = arith.constant 0 : index
      %c0_10 = arith.constant 0 : index
      %c0_11 = arith.constant 0 : index
      %22 = vector.load %arg15[%c0, %c0_9, %c0_10, %c0_11] : memref<1x1x8x8xf32, #tpu.memory_space<vmem>>, vector<1x1x8x8xf32>
      %23 = vector.shape_cast %22 : vector<1x1x8x8xf32> to vector<8x8xf32>
      %24 = vector.shape_cast %21 : vector<8x8xf32> to vector<1x1x8x8xf32>
      tpu.vector_store %arg15[%c0, %c0_9, %c0_10, %c0_11], %24 {strides = array<i32>} : memref<1x1x8x8xf32, #tpu.memory_space<vmem>>, vector<1x1x8x8xf32>,
    } else {
    }
    return
  }
  func.func @transform_0(%arg0: i32, %arg1: i32, %arg2: i32, %arg3: i32) -> (i32, i32, i32, i32) {
    %c0_i32 = arith.constant 0 : i32
    %c0_i32_0 = arith.constant 0 : i32
    return %arg0, %arg1, %arg2, %c0_i32 : i32, i32, i32, i32
  }
  func.func @transform_1(%arg0: i32, %arg1: i32, %arg2: i32, %arg3: i32) -> (i32, i32, i32, i32) {
    %c1_i32 = arith.constant 1 : i32
    %0 = arith.minsi %arg2, %c1_i32 : i32
    %c1_i32_0 = arith.constant 1 : i32
    %1 = arith.subi %c1_i32_0, %0 : i32
    %2 = arith.muli %arg3, %1 : i32
    %c0_i32 = arith.constant 0 : i32
    %c0_i32_1 = arith.constant 0 : i32
    return %arg0, %arg1, %2, %c0_i32 : i32, i32, i32, i32
  }
  func.func @transform_2(%arg0: i32, %arg1: i32, %arg2: i32, %arg3: i32) -> (i32, i32) {
    %c0_i32 = arith.constant 0 : i32
    %c0_i32_0 = arith.constant 0 : i32
    %c0_i32_1 = arith.constant 0 : i32
    return %c0_i32, %c0_i32_0 : i32, i32
  }
  func.func @transform_3(%arg0: i32, %arg1: i32, %arg2: i32, %arg3: i32) -> (i32, i32) {
    %c0_i32 = arith.constant 0 : i32
    %c0_i32_0 = arith.constant 0 : i32
    %c0_i32_1 = arith.constant 0 : i32
    return %c0_i32, %c0_i32_0 : i32, i32
  }
  func.func @transform_4(%arg0: i32, %arg1: i32, %arg2: i32, %arg3: i32) -> (i32, i32) {
    %c0_i32 = arith.constant 0 : i32
    %c0_i32_0 = arith.constant 0 : i32
    return %arg2, %c0_i32 : i32, i32
  }
  func.func @transform_5(%arg0: i32, %arg1: i32, %arg2: i32, %arg3: i32) -> (i32, i32) {
    %c0_i32 = arith.constant 0 : i32
    %c0_i32_0 = arith.constant 0 : i32
    return %arg2, %c0_i32 : i32, i32
  }
  func.func @transform_6(%arg0: i32, %arg1: i32, %arg2: i32, %arg3: i32) -> (i32, i32) {
    %c1_i32 = arith.constant 1 : i32
    %0 = arith.minsi %arg2, %c1_i32 : i32
    %c1_i32_0 = arith.constant 1 : i32
    %1 = arith.subi %c1_i32_0, %0 : i32
    %2 = arith.muli %arg3, %1 : i32
    %c0_i32 = arith.constant 0 : i32
    %c0_i32_1 = arith.constant 0 : i32
    return %2, %c0_i32 : i32, i32
  }
  func.func @transform_7(%arg0: i32, %arg1: i32, %arg2: i32, %arg3: i32) -> (i32, i32) {
    %c1_i32 = arith.constant 1 : i32
    %0 = arith.minsi %arg2, %c1_i32 : i32
    %c1_i32_0 = arith.constant 1 : i32
    %1 = arith.subi %c1_i32_0, %0 : i32
    %2 = arith.muli %arg3, %1 : i32
    %c0_i32 = arith.constant 0 : i32
    %c0_i32_1 = arith.constant 0 : i32
    return %2, %c0_i32 : i32, i32
  }
  func.func @transform_8(%arg0: i32, %arg1: i32, %arg2: i32, %arg3: i32) -> (i32, i32) {
    %c0_i32 = arith.constant 0 : i32
    %c0_i32_0 = arith.constant 0 : i32
    return %arg2, %c0_i32 : i32, i32
  }
  func.func @transform_9(%arg0: i32, %arg1: i32, %arg2: i32, %arg3: i32) -> (i32, i32) {
    %c0_i32 = arith.constant 0 : i32
    %c0_i32_0 = arith.constant 0 : i32
    %c0_i32_1 = arith.constant 0 : i32
    return %c0_i32, %c0_i32_0 : i32, i32
  }
  func.func @transform_10(%arg0: i32, %arg1: i32, %arg2: i32, %arg3: i32) -> (i32, i32, i32, i32) {
    %c0_i32 = arith.constant 0 : i32
    %c0_i32_0 = arith.constant 0 : i32
    return %arg0, %arg1, %arg2, %c0_i32 : i32, i32, i32, i32
  }
  func.func @transform_11(%arg0: i32, %arg1: i32, %arg2: i32, %arg3: i32) -> (i32, i32, i32, i32) {
    %c0_i32 = arith.constant 0 : i32
    return %arg0, %arg1, %arg2, %arg3 : i32, i32, i32, i32
  }
}

module attributes {stable_mosaic.version = 11 : i64} {
  func.func @kernel(%arg0: i32, %arg1: i32, %arg2: i32, %arg3: i32, %arg4: memref<1x1x8x32xbf16, #tpu.memory_space<vmem>>, %arg5: memref<1x1x8x32xbf16, #tpu.memory_space<vmem>>, %arg6: memref<32x256xbf16, #tpu.memory_space<vmem>>, %arg7: memref<32x384xbf16, #tpu.memory_space<vmem>>, %arg8: memref<8x128xf32, #tpu.memory_space<vmem>>, %arg9: memref<8x128xf32, #tpu.memory_space<vmem>>, %arg10: memref<8x128xf32, #tpu.memory_space<vmem>>, %arg11: memref<8x128xf32, #tpu.memory_space<vmem>>, %arg12: memref<8x1xf32, #tpu.memory_space<vmem>>, %arg13: memref<8x8xf32, #tpu.memory_space<vmem>>, %arg14: memref<1x1x8x128xf32, #tpu.memory_space<vmem>>, %arg15: memref<1x1x8x8xf32, #tpu.memory_space<vmem>>, %arg16: memref<8x128xbf16, #tpu.memory_space<vmem>>, %arg17: memref<8x128xbf16, #tpu.memory_space<vmem>>, %arg18: memref<8x128xbf16, #tpu.memory_space<vmem>>) attributes {dimension_semantics = [#tpu.dimension_semantics<parallel>, #tpu.dimension_semantics<parallel>, #tpu.dimension_semantics<arbitrary>, #tpu.dimension_semantics<arbitrary>], iteration_bounds = array<i64: 2, 2, 1, 1>, scalar_prefetch = 0 : i64, scratch_operands = 3 : i64, tpu.core_type = #tpu.core_type<tc>, window_params = [{transform_indices = @transform_0, window_bounds = array<i64: 1, 1, 8, 32>}, {transform_indices = @transform_1, window_bounds = array<i64: 1, 1, 8, 32>}, {pipeline_mode = #tpu.pipeline_mode<synchronous>, transform_indices = @transform_2, window_bounds = array<i64: 32, 256>}, {pipeline_mode = #tpu.pipeline_mode<synchronous>, transform_indices = @transform_3, window_bounds = array<i64: 32, 384>}, {transform_indices = @transform_4, window_bounds = array<i64: 8, 128>}, {transform_indices = @transform_5, window_bounds = array<i64: 8, 128>}, {transform_indices = @transform_6, window_bounds = array<i64: 8, 128>}, {transform_indices = @transform_7, window_bounds = array<i64: 8, 128>}, {transform_indices = @transform_8, window_bounds = array<i64: 8, 1>}, {pipeline_mode = #tpu.pipeline_mode<synchronous>, transform_indices = @transform_9, window_bounds = array<i64: 8, 8>}, {transform_indices = @transform_10, window_bounds = array<i64: 1, 1, 8, 128>}, {transform_indices = @transform_11, window_bounds = array<i64: 1, 1, 8, 8>}]} {
    %c0_i32 = arith.constant 0 : i32
    %0 = arith.cmpi eq, %arg2, %c0_i32 : i32
    %1 = arith.extui %0 : i1 to i32
    %c0_i32_0 = arith.constant 0 : i32
    %2 = arith.cmpi ne, %1, %c0_i32_0 : i32
    scf.if %2 {
      %c0 = arith.constant 0 : index
      %c0_9 = arith.constant 0 : index
      %c0_10 = arith.constant 0 : index
      %c0_11 = arith.constant 0 : index
      %21 = vector.load %arg5[%c0, %c0_9, %c0_10, %c0_11] : memref<1x1x8x32xbf16, #tpu.memory_space<vmem>>, vector<1x1x8x32xbf16>
      %22 = vector.shape_cast %21 : vector<1x1x8x32xbf16> to vector<8x32xbf16>
      %c0_12 = arith.constant 0 : index
      %c0_13 = arith.constant 0 : index
      %23 = vector.load %arg7[%c0_12, %c0_13] : memref<32x384xbf16, #tpu.memory_space<vmem>>, vector<32x384xbf16>
      %cst = arith.constant dense<0.000000e+00> : vector<8x384xf32>
      %24 = tpu.matmul %22, %23, %cst {dimension_numbers = #tpu.dot_dimension_numbers<[1], [0], [0], [1], [0, 0, 1, 1], [], []>} : vector<8x32xbf16>, vector<32x384xbf16>, vector<8x384xf32> -> vector<8x384xf32>
      %25 = vector.extract_strided_slice %24 {offsets = [0, 0], sizes = [8, 128], strides = [1, 1]} : vector<8x384xf32> to vector<8x128xf32>
      %26 = vector.extract_strided_slice %24 {offsets = [0, 128], sizes = [8, 128], strides = [1, 1]} : vector<8x384xf32> to vector<8x128xf32>
      %27 = vector.extract_strided_slice %24 {offsets = [0, 256], sizes = [8, 128], strides = [1, 1]} : vector<8x384xf32> to vector<8x128xf32>
      %c0_14 = arith.constant 0 : index
      %c0_15 = arith.constant 0 : index
      %28 = vector.load %arg11[%c0_14, %c0_15] : memref<8x128xf32, #tpu.memory_space<vmem>>, vector<8x128xf32>
      %29 = arith.mulf %25, %28 : vector<8x128xf32>
      %c0_16 = arith.constant 0 : index
      %c0_17 = arith.constant 0 : index
      %30 = vector.load %arg10[%c0_16, %c0_17] : memref<8x128xf32, #tpu.memory_space<vmem>>, vector<8x128xf32>
      %31 = arith.mulf %26, %30 : vector<8x128xf32>
      %32 = arith.subf %29, %31 : vector<8x128xf32>
      %33 = arith.truncf %32 : vector<8x128xf32> to vector<8x128xbf16>
      %34 = arith.truncf %27 : vector<8x128xf32> to vector<8x128xbf16>
      %c8_i32_18 = arith.constant 8 : i32
      %35 = arith.muli %arg3, %c8_i32_18 : i32
      %36 = tpu.assume_multiple %35, 8 : i32
      %37 = arith.index_cast %36 : i32 to index
      %c0_19 = arith.constant 0 : index
      %38 = vector.load %arg17[%37, %c0_19] : memref<8x128xbf16, #tpu.memory_space<vmem>>, vector<8x128xbf16>
      tpu.vector_store %arg17[%37, %c0_19], %33 {strides = array<i32>} : memref<8x128xbf16, #tpu.memory_space<vmem>>, vector<8x128xbf16>,
      %39 = arith.index_cast %36 : i32 to index
      %c0_20 = arith.constant 0 : index
      %40 = vector.load %arg18[%39, %c0_20] : memref<8x128xbf16, #tpu.memory_space<vmem>>, vector<8x128xbf16>
      tpu.vector_store %arg18[%39, %c0_20], %34 {strides = array<i32>} : memref<8x128xbf16, #tpu.memory_space<vmem>>, vector<8x128xbf16>,
    } else {
    }
    %c0_i32_1 = arith.constant 0 : i32
    %3 = arith.cmpi eq, %arg3, %c0_i32_1 : i32
    %4 = arith.extui %3 : i1 to i32
    %c0_i32_2 = arith.constant 0 : i32
    %5 = arith.cmpi ne, %4, %c0_i32_2 : i32
    scf.if %5 {
      %c0 = arith.constant 0 : index
      %c0_9 = arith.constant 0 : index
      %c0_10 = arith.constant 0 : index
      %c0_11 = arith.constant 0 : index
      %21 = vector.load %arg4[%c0, %c0_9, %c0_10, %c0_11] : memref<1x1x8x32xbf16, #tpu.memory_space<vmem>>, vector<1x1x8x32xbf16>
      %22 = vector.shape_cast %21 : vector<1x1x8x32xbf16> to vector<8x32xbf16>
      %c0_12 = arith.constant 0 : index
      %c0_13 = arith.constant 0 : index
      %23 = vector.load %arg6[%c0_12, %c0_13] : memref<32x256xbf16, #tpu.memory_space<vmem>>, vector<32x256xbf16>
      %cst = arith.constant dense<0.000000e+00> : vector<8x256xf32>
      %24 = tpu.matmul %22, %23, %cst {dimension_numbers = #tpu.dot_dimension_numbers<[1], [0], [0], [1], [0, 0, 1, 1], [], []>} : vector<8x32xbf16>, vector<32x256xbf16>, vector<8x256xf32> -> vector<8x256xf32>
      %25 = vector.extract_strided_slice %24 {offsets = [0, 0], sizes = [8, 128], strides = [1, 1]} : vector<8x256xf32> to vector<8x128xf32>
      %26 = vector.extract_strided_slice %24 {offsets = [0, 128], sizes = [8, 128], strides = [1, 1]} : vector<8x256xf32> to vector<8x128xf32>
      %c0_14 = arith.constant 0 : index
      %c0_15 = arith.constant 0 : index
      %27 = vector.load %arg9[%c0_14, %c0_15] : memref<8x128xf32, #tpu.memory_space<vmem>>, vector<8x128xf32>
      %28 = arith.mulf %25, %27 : vector<8x128xf32>
      %c0_16 = arith.constant 0 : index
      %c0_17 = arith.constant 0 : index
      %29 = vector.load %arg8[%c0_16, %c0_17] : memref<8x128xf32, #tpu.memory_space<vmem>>, vector<8x128xf32>
      %30 = arith.mulf %26, %29 : vector<8x128xf32>
      %31 = arith.addf %28, %30 : vector<8x128xf32>
      %32 = arith.truncf %31 : vector<8x128xf32> to vector<8x128xbf16>
      %c0_18 = arith.constant 0 : index
      %c0_19 = arith.constant 0 : index
      %33 = vector.load %arg16[%c0_18, %c0_19] : memref<8x128xbf16, #tpu.memory_space<vmem>>, vector<8x128xbf16>
      tpu.vector_store %arg16[%c0_18, %c0_19], %32 {strides = array<i32>} : memref<8x128xbf16, #tpu.memory_space<vmem>>, vector<8x128xbf16>,
      %cst_20 = arith.constant 0.000000e+00 : f32
      %34 = vector.broadcast %cst_20 : f32 to vector<8x128xf32>
      %c0_21 = arith.constant 0 : index
      %c0_22 = arith.constant 0 : index
      %c0_23 = arith.constant 0 : index
      %c0_24 = arith.constant 0 : index
      %35 = vector.load %arg14[%c0_21, %c0_22, %c0_23, %c0_24] : memref<1x1x8x128xf32, #tpu.memory_space<vmem>>, vector<1x1x8x128xf32>
      %36 = vector.shape_cast %35 : vector<1x1x8x128xf32> to vector<8x128xf32>
      %37 = vector.shape_cast %34 : vector<8x128xf32> to vector<1x1x8x128xf32>
      tpu.vector_store %arg14[%c0_21, %c0_22, %c0_23, %c0_24], %37 {strides = array<i32>} : memref<1x1x8x128xf32, #tpu.memory_space<vmem>>, vector<1x1x8x128xf32>,
    } else {
    }
    %c8_i32 = arith.constant 8 : i32
    %6 = arith.muli %arg2, %c8_i32 : i32
    %c7_i32 = arith.constant 7 : i32
    %7 = arith.addi %6, %c7_i32 : i32
    %c8_i32_3 = arith.constant 8 : i32
    %8 = arith.muli %arg3, %c8_i32_3 : i32
    %9 = arith.cmpi sge, %7, %8 : i32
    %c8_i32_4 = arith.constant 8 : i32
    %10 = arith.muli %arg2, %c8_i32_4 : i32
    %c8_i32_5 = arith.constant 8 : i32
    %11 = arith.muli %arg3, %c8_i32_5 : i32
    %c7_i32_6 = arith.constant 7 : i32
    %12 = arith.addi %11, %c7_i32_6 : i32
    %13 = arith.subi %10, %12 : i32
    %c52_i32 = arith.constant 52 : i32
    %14 = arith.cmpi sle, %13, %c52_i32 : i32
    %15 = arith.andi %9, %14 : i1
    %16 = arith.extui %15 : i1 to i32
    %c0_i32_7 = arith.constant 0 : i32
    %17 = arith.cmpi ne, %16, %c0_i32_7 : i32
    scf.if %17 {
      %c8_i32_9 = arith.constant 8 : i32
      %21 = arith.muli %arg3, %c8_i32_9 : i32
      %22 = tpu.assume_multiple %21, 8 : i32
      %23 = arith.index_cast %22 : i32 to index
      %c0 = arith.constant 0 : index
      %24 = vector.load %arg17[%23, %c0] : memref<8x128xbf16, #tpu.memory_space<vmem>>, vector<8x128xbf16>
      %25 = arith.index_cast %22 : i32 to index
      %c0_10 = arith.constant 0 : index
      %26 = vector.load %arg18[%25, %c0_10] : memref<8x128xbf16, #tpu.memory_space<vmem>>, vector<8x128xbf16>
      %c0_11 = arith.constant 0 : index
      %c0_12 = arith.constant 0 : index
      %27 = vector.load %arg16[%c0_11, %c0_12] : memref<8x128xbf16, #tpu.memory_space<vmem>>, vector<8x128xbf16>
      %cst = arith.constant dense<0.000000e+00> : vector<8x8xf32>
      %28 = tpu.matmul %27, %24, %cst {dimension_numbers = #tpu.dot_dimension_numbers<[1], [1], [0], [0], [0, 0, 1, 0], [], []>} : vector<8x128xbf16>, vector<8x128xbf16>, vector<8x8xf32> -> vector<8x8xf32>
      %c8_i32_13 = arith.constant 8 : i32
      %29 = arith.muli %arg2, %c8_i32_13 : i32
      %c8_i32_14 = arith.constant 8 : i32
      %30 = arith.muli %arg3, %c8_i32_14 : i32
      %31 = arith.subi %29, %30 : i32
      %32 = arith.sitofp %31 : i32 to f32
      %c0_15 = arith.constant 0 : index
      %c0_16 = arith.constant 0 : index
      %33 = vector.load %arg13[%c0_15, %c0_16] : memref<8x8xf32, #tpu.memory_space<vmem>>, vector<8x8xf32>
      %34 = vector.broadcast %32 : f32 to vector<8x8xf32>
      %35 = arith.addf %33, %34 : vector<8x8xf32>
      %cst_17 = arith.constant 0.000000e+00 : f32
      %36 = vector.broadcast %cst_17 : f32 to vector<8x8xf32>
      %37 = arith.cmpf oge, %35, %36 : vector<8x8xf32>
      %cst_18 = arith.constant -2.30258512 : f32
      %38 = vector.broadcast %cst_18 : f32 to vector<8x8xf32>
      %39 = arith.mulf %35, %38 : vector<8x8xf32>
      %c0_19 = arith.constant 0 : index
      %c0_20 = arith.constant 0 : index
      %40 = vector.load %arg12[%c0_19, %c0_20] : memref<8x1xf32, #tpu.memory_space<vmem>>, vector<8x1xf32>
      %41 = vector.broadcast %40 : vector<8x1xf32> to vector<8x8xf32>
      %42 = arith.addf %39, %41 : vector<8x8xf32>
      %43 = math.exp %42 : vector<8x8xf32>
      %cst_21 = arith.constant 0.000000e+00 : f32
      %44 = vector.broadcast %cst_21 : f32 to vector<8x8xf32>
      %45 = arith.select %37, %43, %44 : vector<8x8xi1>, vector<8x8xf32>
      %46 = arith.mulf %28, %45 : vector<8x8xf32>
      %47 = arith.truncf %46 : vector<8x8xf32> to vector<8x8xbf16>
      %c0_22 = arith.constant 0 : index
      %c0_23 = arith.constant 0 : index
      %c0_24 = arith.constant 0 : index
      %c0_25 = arith.constant 0 : index
      %48 = vector.load %arg15[%c0_22, %c0_23, %c0_24, %c0_25] : memref<1x1x8x8xf32, #tpu.memory_space<vmem>>, vector<1x1x8x8xf32>
      %49 = vector.shape_cast %48 : vector<1x1x8x8xf32> to vector<8x8xf32>
      %50 = vector.shape_cast %46 : vector<8x8xf32> to vector<1x1x8x8xf32>
      tpu.vector_store %arg15[%c0_22, %c0_23, %c0_24, %c0_25], %50 {strides = array<i32>} : memref<1x1x8x8xf32, #tpu.memory_space<vmem>>, vector<1x1x8x8xf32>,
      %c0_26 = arith.constant 0 : index
      %c0_27 = arith.constant 0 : index
      %c0_28 = arith.constant 0 : index
      %c0_29 = arith.constant 0 : index
      %51 = vector.load %arg14[%c0_26, %c0_27, %c0_28, %c0_29] : memref<1x1x8x128xf32, #tpu.memory_space<vmem>>, vector<1x1x8x128xf32>
      %52 = vector.shape_cast %51 : vector<1x1x8x128xf32> to vector<8x128xf32>
      %cst_30 = arith.constant dense<0.000000e+00> : vector<8x128xf32>
      %53 = tpu.matmul %47, %26, %cst_30 {dimension_numbers = #tpu.dot_dimension_numbers<[1], [0], [0], [1], [0, 0, 1, 1], [], []>} : vector<8x8xbf16>, vector<8x128xbf16>, vector<8x128xf32> -> vector<8x128xf32>
      %54 = arith.addf %52, %53 : vector<8x128xf32>
      %c0_31 = arith.constant 0 : index
      %c0_32 = arith.constant 0 : index
      %c0_33 = arith.constant 0 : index
      %c0_34 = arith.constant 0 : index
      %55 = vector.load %arg14[%c0_31, %c0_32, %c0_33, %c0_34] : memref<1x1x8x128xf32, #tpu.memory_space<vmem>>, vector<1x1x8x128xf32>
      %56 = vector.shape_cast %55 : vector<1x1x8x128xf32> to vector<8x128xf32>
      %57 = vector.shape_cast %54 : vector<8x128xf32> to vector<1x1x8x128xf32>
      tpu.vector_store %arg14[%c0_31, %c0_32, %c0_33, %c0_34], %57 {strides = array<i32>} : memref<1x1x8x128xf32, #tpu.memory_space<vmem>>, vector<1x1x8x128xf32>,
    } else {
    }
    %true = arith.constant true
    %18 = arith.xori %15, %true : i1
    %19 = arith.extui %18 : i1 to i32
    %c0_i32_8 = arith.constant 0 : i32
    %20 = arith.cmpi ne, %19, %c0_i32_8 : i32
    scf.if %20 {
      %cst = arith.constant 0.000000e+00 : f32
      %21 = vector.broadcast %cst : f32 to vector<8x8xf32>
      %c0 = arith.constant 0 : index
      %c0_9 = arith.constant 0 : index
      %c0_10 = arith.constant 0 : index
      %c0_11 = arith.constant 0 : index
      %22 = vector.load %arg15[%c0, %c0_9, %c0_10, %c0_11] : memref<1x1x8x8xf32, #tpu.memory_space<vmem>>, vector<1x1x8x8xf32>
      %23 = vector.shape_cast %22 : vector<1x1x8x8xf32> to vector<8x8xf32>
      %24 = vector.shape_cast %21 : vector<8x8xf32> to vector<1x1x8x8xf32>
      tpu.vector_store %arg15[%c0, %c0_9, %c0_10, %c0_11], %24 {strides = array<i32>} : memref<1x1x8x8xf32, #tpu.memory_space<vmem>>, vector<1x1x8x8xf32>,
    } else {
    }
    return
  }
  func.func @transform_0(%arg0: i32, %arg1: i32, %arg2: i32, %arg3: i32) -> (i32, i32, i32, i32) {
    %c0_i32 = arith.constant 0 : i32
    %c0_i32_0 = arith.constant 0 : i32
    return %arg0, %arg1, %arg2, %c0_i32 : i32, i32, i32, i32
  }
  func.func @transform_1(%arg0: i32, %arg1: i32, %arg2: i32, %arg3: i32) -> (i32, i32, i32, i32) {
    %c1_i32 = arith.constant 1 : i32
    %0 = arith.minsi %arg2, %c1_i32 : i32
    %c1_i32_0 = arith.constant 1 : i32
    %1 = arith.subi %c1_i32_0, %0 : i32
    %2 = arith.muli %arg3, %1 : i32
    %c0_i32 = arith.constant 0 : i32
    %c0_i32_1 = arith.constant 0 : i32
    return %arg0, %arg1, %2, %c0_i32 : i32, i32, i32, i32
  }
  func.func @transform_2(%arg0: i32, %arg1: i32, %arg2: i32, %arg3: i32) -> (i32, i32) {
    %c0_i32 = arith.constant 0 : i32
    %c0_i32_0 = arith.constant 0 : i32
    %c0_i32_1 = arith.constant 0 : i32
    return %c0_i32, %c0_i32_0 : i32, i32
  }
  func.func @transform_3(%arg0: i32, %arg1: i32, %arg2: i32, %arg3: i32) -> (i32, i32) {
    %c0_i32 = arith.constant 0 : i32
    %c0_i32_0 = arith.constant 0 : i32
    %c0_i32_1 = arith.constant 0 : i32
    return %c0_i32, %c0_i32_0 : i32, i32
  }
  func.func @transform_4(%arg0: i32, %arg1: i32, %arg2: i32, %arg3: i32) -> (i32, i32) {
    %c0_i32 = arith.constant 0 : i32
    %c0_i32_0 = arith.constant 0 : i32
    return %arg2, %c0_i32 : i32, i32
  }
  func.func @transform_5(%arg0: i32, %arg1: i32, %arg2: i32, %arg3: i32) -> (i32, i32) {
    %c0_i32 = arith.constant 0 : i32
    %c0_i32_0 = arith.constant 0 : i32
    return %arg2, %c0_i32 : i32, i32
  }
  func.func @transform_6(%arg0: i32, %arg1: i32, %arg2: i32, %arg3: i32) -> (i32, i32) {
    %c1_i32 = arith.constant 1 : i32
    %0 = arith.minsi %arg2, %c1_i32 : i32
    %c1_i32_0 = arith.constant 1 : i32
    %1 = arith.subi %c1_i32_0, %0 : i32
    %2 = arith.muli %arg3, %1 : i32
    %c0_i32 = arith.constant 0 : i32
    %c0_i32_1 = arith.constant 0 : i32
    return %2, %c0_i32 : i32, i32
  }
  func.func @transform_7(%arg0: i32, %arg1: i32, %arg2: i32, %arg3: i32) -> (i32, i32) {
    %c1_i32 = arith.constant 1 : i32
    %0 = arith.minsi %arg2, %c1_i32 : i32
    %c1_i32_0 = arith.constant 1 : i32
    %1 = arith.subi %c1_i32_0, %0 : i32
    %2 = arith.muli %arg3, %1 : i32
    %c0_i32 = arith.constant 0 : i32
    %c0_i32_1 = arith.constant 0 : i32
    return %2, %c0_i32 : i32, i32
  }
  func.func @transform_8(%arg0: i32, %arg1: i32, %arg2: i32, %arg3: i32) -> (i32, i32) {
    %c0_i32 = arith.constant 0 : i32
    %c0_i32_0 = arith.constant 0 : i32
    return %arg2, %c0_i32 : i32, i32
  }
  func.func @transform_9(%arg0: i32, %arg1: i32, %arg2: i32, %arg3: i32) -> (i32, i32) {
    %c0_i32 = arith.constant 0 : i32
    %c0_i32_0 = arith.constant 0 : i32
    %c0_i32_1 = arith.constant 0 : i32
    return %c0_i32, %c0_i32_0 : i32, i32
  }
  func.func @transform_10(%arg0: i32, %arg1: i32, %arg2: i32, %arg3: i32) -> (i32, i32, i32, i32) {
    %c0_i32 = arith.constant 0 : i32
    %c0_i32_0 = arith.constant 0 : i32
    return %arg0, %arg1, %arg2, %c0_i32 : i32, i32, i32, i32
  }
  func.func @transform_11(%arg0: i32, %arg1: i32, %arg2: i32, %arg3: i32) -> (i32, i32, i32, i32) {
    %c0_i32 = arith.constant 0 : i32
    return %arg0, %arg1, %arg2, %arg3 : i32, i32, i32, i32
  }
}

</mosaic_0001>

<bundles_post_ra>
// kernel: tpu_custom_call.1
= control target key start
LH: loop header
LB: loop body
LE: loop exit
PB: predicated region body
PF: predicated region fallthrough
CT: control target
= control target key end

     0   :  { %s2140_s0 = inlined_call_operand.hbm [shape: bf16[2,2,8,32], index: 0, kind: input, shape index: {}]   ;;  %s2141_s1 = inlined_call_operand.hbm [shape: bf16[2,2,8,32], index: 1, kind: input, shape index: {}]   ;;  %s2142_s2 = inlined_call_operand.hbm [shape: bf16[32,256], index: 2, kind: input, shape index: {}]   ;;  %s2143_s3 = inlined_call_operand.hbm [shape: bf16[32,384], index: 3, kind: input, shape index: {}]   ;;  %s2144_s4 = inlined_call_operand.vmem [shape: f32[8,128], index: 4, kind: input, shape index: {}]   ;;  %s2145_s5 = inlined_call_operand.hbm [shape: f32[8,128], index: 5, kind: input, shape index: {}]   ;;  %s2146_s6 = inlined_call_operand.hbm [shape: f32[8,128], index: 6, kind: input, shape index: {}]   ;;  %s2147_s7 = inlined_call_operand.hbm [shape: f32[8,128], index: 7, kind: input, shape index: {}]   ;;  %s2148_s8 = inlined_call_operand.vmem [shape: f32[8,1], index: 8, kind: input, shape index: {}]   ;;  %s2149_s9 = inlined_call_operand.vmem [shape: f32[8,8], index: 9, kind: input, shape index: {}]   ;;  %s2150_s10 = inlined_call_operand.hbm [shape: f32[2,2,8,128], index: 10, kind: output, shape index: {0}]   ;;  %s2151_s11 = inlined_call_operand.hbm [shape: f32[2,2,8,8], index: 11, kind: output, shape index: {1}]  }
   0x1   :  { %2160 = sst [smem:[#allocation35_spill]] %s2142_s2 }
   0x2   :  { %2161 = sst [smem:[#allocation36_spill]] %s2143_s3 }
   0x3   :  { %2162 = sst [smem:[#allocation37_spill]] %s2145_s5 }
   0x4   :  { %2163 = sst [smem:[#allocation38_spill]] %s2146_s6 }
   0x5   :  { %2164 = sst [smem:[#allocation39_spill]] %s2147_s7 }
   0x6   :  { %2165 = sst [smem:[#allocation40_spill]] %s2150_s10 }
   0x7   :  { %2166 = sst [smem:[#allocation41_spill]] %s2151_s11 }
   0x8   :  { %17 = vsyncpa [#allocation6], 0 }
   0x9   :  { %19 = vsyncpa [#allocation6 + $0x1], 0 }
   0xa   :  { %20 = vsyncpa [#allocation9], 0 }
   0xb   :  { %22 = vsyncpa [#allocation9 + $0x1], 0 }
   0xc   :  { %23 = vsyncpa [#allocation12], 0 }
   0xd   :  { %24 = vsyncpa [#allocation15], 0 }
   0xe   :  { %25 = vsyncpa [#allocation7], 0 }
   0xf   :  { %27 = vsyncpa [#allocation7 + $0x1], 0 }
  0x10   :  { %28 = vsyncpa [#allocation19], 0 }
  0x11   :  { %30 = vsyncpa [#allocation19 + $0x1], 0  ;;  %s1893_s17 = smov 0   ;;  %s1895_s18 = smov 0  }
  0x12   :  { %s1897_s19 = smov 0   ;;  %s1899_s20 = smov 0  }
  0x13   :  { %s1901_s21 = smov 0   ;;  %s1903_s22 = smov 0  }
  0x14   :  { %s1905_s23 = smov 0   ;;  %s1907_s24 = smov 0  }
  0x15 LB: > { %2167 = sst [smem:[#allocation27_spill]] %s1793_s17  ;;  %s1934_s25 = sadd.s32 4294967295, %s1821_s24   ;;  %s1821_s24 = sphi %s1907_s24, %s36_s24   ;;  %s1817_s23 = sphi %s1905_s23, %s2195_s23   ;;  %s1813_s22 = sphi %s1903_s22, %s2194_s22   ;;  %s1809_s21 = sphi %s1901_s21, %s2193_s21   ;;  %s1805_s20 = sphi %s1899_s20, %s2192_s20   ;;  %s1801_s19 = sphi %s1897_s19, %s2198_s19   ;;  %s1797_s18 = sphi %s1895_s18, %s2197_s18   ;;  %s1793_s17 = sphi %s1893_s17, %s2196_s17  }
  0x16   : > { %2168 = sst [smem:[#allocation28_spill]] %s1805_s20  ;;  %p1228_p0 = scmp.ge.s32.totalorder %s1821_s24, 1 }
  0x17   : > { %2169 = sst [smem:[#allocation29_spill]] %s1809_s21  ;;  %p87_p1 = scmp.eq.s32.totalorder %s1934_s25, 0 }
  0x18   : > { %2170 = sst [smem:[#allocation30_spill]] %s1813_s22  ;;  %p406_p2 = scmp.lt.s32.totalorder %s1821_s24, 5 }
  0x19   : > { %2171 = sst [smem:[#allocation31_spill]] %s1817_s23  ;;  %s1823_s30 = smov [#allocation10]  }
  0x1a   : > { %s2172_s2 = sld [smem:[#allocation35_spill]]  ;;  %p1942_p3 = pnand %p1228_p0, %p406_p2 }
  0x1b   : > { %s419_s12 = sshll.u32 %s1823_s30, 4  ;;  %s2175_s3 = sld [smem:[#allocation36_spill]]  ;;  %s420_s12 = int_to_ptr.vmem [resolvable:$true] %s419_s12 }
  0x1c   : > { %p1345_p4 = pneg %p1942_p3  ;;  %s1824_s26 = smov 128  }
  0x1d   : > { %s1825_s27 = smov 8   ;;  %s1827_s10 = smov 192  }
  0x1e   : > { %p1950_p5 = pnand %p1345_p4, %p87_p1  ;;  %s1828_s11 = smov 12  }
  0x1f   : > { %s2176_s6 = sld [smem:[#allocation38_spill]]  ;;  %s1829_s15 = smov [#allocation14]  }
  0x20   : > { %s417_s28 = sshll.u32 %s2172_s2, 4  ;;  %s1826_s2 = smov [#allocation11]   ;;  %s418_s28 = int_to_ptr.hbm [resolvable:$true] %s417_s28 }
  0x21   : > { %s431_s16 = sshll.u32 %s2175_s3, 4  ;;  %s433_s30 = sshll.u32 %s1826_s2, 4  ;;  %s432_s16 = int_to_ptr.hbm [resolvable:$true] %s431_s16  ;;  %s434_s30 = int_to_ptr.vmem [resolvable:$true] %s433_s30 }
  0x22   : > { %1348 = dma.hbm_to_vmem [thread:$0]  (!%p1950_p5), %s418_s28, 512, %s420_s12, [#allocation9], %s1824_s26, %s1824_s26, %s1825_s27  }
  0x23   : > { %1351 = dma.hbm_to_vmem [thread:$0]  (!%p1950_p5), %s432_s16, 768, %s434_s30, [#allocation12], %s1827_s10, %s1827_s10, %s1828_s11  }
  0x24   : > { %s475_s3 = sshll.u32 %s1829_s15, 4  ;;  %s2177_s5 = sld [smem:[#allocation37_spill]]  ;;  %s476_s3 = int_to_ptr.vmem [resolvable:$true] %s475_s3 }
  0x25   : > { %s473_s14 = sshll.u32 %s2176_s6, 4  ;;  %s1830_s10 = smov [#allocation13]   ;;  %s474_s14 = int_to_ptr.hbm [resolvable:$true] %s473_s14 }
  0x26   : > { %1357 = dma.hbm_to_vmem [thread:$0]  (!%p1950_p5), %s474_s14, 128, %s476_s3, [#allocation15]  }
  0x27   : > { %s457_s11 = sshll.u32 %s1830_s10, 4  ;;  %s2178_s7 = sld [smem:[#allocation39_spill]]  ;;  %s458_s11 = int_to_ptr.vmem [resolvable:$true] %s457_s11 }
  0x28   : > { %s1831_s26 = smov [#allocation16]   ;;  %s1227_s27 = sadd.s32 4294967294, %s1821_s24  }
  0x29   : > { %s493_s3 = sshll.u32 %s1831_s26, 4  ;;  %s58_s30 = sadd.s32 1, %s1813_s22  ;;  %s494_s3 = int_to_ptr.vmem [resolvable:$true] %s493_s3 }
  0x2a   : > { %s455_s2 = sshll.u32 %s2177_s5, 4  ;;  %s62_s14 = sadd.s32 1, %s1817_s23  ;;  %s456_s2 = int_to_ptr.hbm [resolvable:$true] %s455_s2 }
  0x2b   : > { %1354 = dma.hbm_to_vmem [thread:$0]  (!%p1950_p5), %s456_s2, 128, %s458_s11, [#allocation12]  }
  0x2c   : > { %p60_p6 = scmp.ge.s32.totalorder %s58_s30, 2  ;;  %s73_s15 = sadd.s32 1, %s1801_s19 }
  0x2d   : > { %s491_s16 = sshll.u32 %s2178_s7, 4  ;;  %p80_p7 = scmp.ne.s32.totalorder %s1801_s19, %s1797_s18  ;;  %s492_s16 = int_to_ptr.hbm [resolvable:$true] %s491_s16 }
  0x2e   : > { %1360 = dma.hbm_to_vmem [thread:$0]  (!%p1950_p5), %s492_s16, 128, %s494_s3, [#allocation15]  }
  0x2f   : > { %p81_p8 = scmp.eq.s32.totalorder %s1821_s24, 0  ;;  %s2200_s30 = smov (%p60_p6, %s58_s30), 0 }
  0x30   : > { %2179 = sst [smem:[#allocation32_spill]] %s2200_s30  ;;  %s2202_s14 = smov (!%p60_p6, %s62_s14), %s1817_s23 }
  0x31   : > { %s67_s28 = ssub.s32 %s1813_s22, %s2200_s30  ;;  %p1988_p9 = por %p81_p8, %p80_p7 }
  0x32   : > { %p64_p10 = scmp.ge.s32.totalorder %s2202_s14, 2  ;;  %p86_p11 = scmp.ne.s32.totalorder %s1797_s18, %s1793_s17 }
  0x33   : > { %p361_p12 = scmp.eq.s32.totalorder %s1934_s25, 3  ;;  %p367_p13 = scmp.eq.s32.totalorder %s1227_s27, 3 }
  0x34   : > { %s2204_s14 = smov (%p64_p10, %s2202_s14), 0  ;;  %p1999_p0 = por %p87_p1, %p86_p11 }
  0x35   : > { %2181 = sst [smem:[#allocation33_spill]] %s2204_s14  ;;  %p2003_p2 = por %p361_p12, %p80_p7 }
  0x36   : > { %s66_s10 = ssub.s32 %s1817_s23, %s2204_s14  ;;  %p2009_p4 = por %p367_p13, %p86_p11 }
  0x37   : > { %s68_s20 = sor.u32 %s67_s28, %s66_s10  ;;  %p1380_p5 = scmp.lt.s32.totalorder %s1821_s24, 4 }
  0x38   : > { %s2184_s11 = scalar_select %p2009_p4, 1, 0 }
  0x39   : > { %p71_p6 = scmp.eq.s32.totalorder %s68_s20, 0  ;;  %s514_s21 = sand.u32 1, %s1801_s19  }
  0x3a   : > { %2185 = sst [smem:[#allocation34_spill]] %s2184_s11  ;;  %s1237_s16 = sshll.u32 %s514_s21, 2 }
  0x3b   : > { %s2016_s26 = scalar_select %p71_p6, %s1801_s19, %s73_s15  }
  0x3c   : > { %s1238_s3 = sshll.u32 %s1817_s23, 1  ;;  %s518_s5 = scalar_lea.vmem [#allocation5], %s1237_s16 }
  0x3d   : > { %s523_s27 = sadd.s32 %s1813_s22, %s1238_s3  ;;  %s529_s6 = sshll.u32 %s518_s5, 4  ;;  %s530_s6 = int_to_ptr.vmem [resolvable:$true] %s529_s6 }
  0x3e   : > { %s1239_s7 = sshll.u32 %s523_s27, 2  ;;  %p1362_p7 = pnand %p1380_p5, %p1988_p9 }
  0x3f   : > { %s525_s17 = scalar_lea.hbm %s2140_s0, %s1239_s7  ;;  %s515_s10 = scalar_lea.sflag [#allocation6], %s514_s21 }
  0x40   : > { %s527_s28 = sshll.u32 %s525_s17, 4  ;;  %s551_s15 = scalar_lea.hbm %s2141_s1, %s1239_s7  ;;  %s528_s28 = int_to_ptr.hbm [resolvable:$true] %s527_s28 }
  0x41   : > { %1364 = dma.hbm_to_vmem [thread:$0]  (!%p1362_p7), %s528_s28, 64, %s530_s6, %s515_s10  }
  0x42   : > { %s536_s23 = sand.u32 1, %s1821_s24   ;;  %s553_s3 = sshll.u32 %s551_s15, 4  ;;  %s554_s3 = int_to_ptr.hbm [resolvable:$true] %s553_s3 }
  0x43   : > { %s540_s5 = scalar_lea.vmem [#allocation8], %s1237_s16  ;;  %s537_s22 = scalar_lea.sflag [#allocation9], %s536_s23 }
  0x44   : > { %s555_s27 = sshll.u32 %s540_s5, 4  ;;  %564 = sbr.rel (%p1942_p3) target bundleno = 519 (0x207), region = 60  ;;  %s556_s27 = int_to_ptr.vmem [resolvable:$true] %s555_s27 }
  0x45   : > { %1367 = dma.hbm_to_vmem [thread:$0]  (!%p1362_p7), %s554_s3, 64, %s556_s27, %s537_s22  }
  0x46   : > { %s2032_s17 = sand.u32 (!%p1942_p3), 1, %s1797_s18  }
  0x47   : > { %s1244_s6 = sshll.u32 (!%p1942_p3), %s2032_s17, 2  ;;  %s567_s30 = scalar_lea.sflag (!%p1942_p3), [#allocation6], %s2032_s17 }
  0x48   : > { %s2036_s7 = scalar_lea.vmem (!%p1942_p3), [#allocation5], %s1244_s6 }
  0x49   : > { %1764 = dma.done.wait (%p1999_p0), %s567_s30, 64  }
  0x4a   : > { %1766 = vsyncadd (%p1999_p0), %s567_s30, 4294967232  ;;  %s576_s22 = sand.u32 1, %s1934_s25   ;;  %s2043_s29 = scalar_lea.vmem [#allocation8], %s1244_s6 }
  0x4b   : > { %s577_s23 = scalar_lea.sflag [#allocation9], %s576_s22 }
  0x4c   : > { %1768 = dma.done.wait (%p1999_p0), %s577_s23, 64  }
  0x4d   : > { %1770 = vsyncadd (%p1999_p0), %s577_s23, 4294967232 }
  0x4e   : > { %1772 = dma.done.wait (%p87_p1), [#allocation9], 512  }
  0x4f   : > { %1774 = vsyncadd (%p87_p1), [#allocation9], 4294966784 }
  0x50   : > { %1776 = dma.done.wait (%p87_p1), [#allocation12], 896  }
  0x51   : > { %1778 = vsyncadd (%p87_p1), [#allocation12], 4294966400 }
  0x52   : > { %1780 = dma.done.wait (%p87_p1), [#allocation15], 256  }
  0x53   : > { %1782 = vsyncadd (%p87_p1), [#allocation15], 4294967040  ;;  %v1267_v0 = vld [vmem:[#allocation11 + $0x18] sm:$0xf]  ;;  %v1311_v1 = vld [vmem:[#allocation11 + $0x20] sm:$0xf0] }
  0x54   : > { %v1310_v2 = vld [vmem:[#allocation11 + $0x1c] sm:$0xf]  ;;  %v1268_v3 = vor.u32 %v1311_v1, %v1267_v0  ;;  %v1269_v4 = vld [vmem:[#allocation11 + $0x24] sm:$0xf0]  ;;  %v1290_v5 = vld [vmem:[#allocation10 + $0x10] sm:$0xf] }
  0x55   : > { %v1316_v6 = vld [vmem:[#allocation10 + $0x14] sm:$0xf0]  ;;  %v1272_v7 = vor.u32 %v1310_v2, %v1269_v4  ;;  %v1255_v9 = vld [vmem:[#allocation11] sm:$0xf]  ;;  %v1308_v10 = vld [vmem:[#allocation11 + $0x8] sm:$0xf0] }
  0x56   : > { %v1291_v8 = vor.u32 %v1316_v6, %v1290_v5  ;;  %v1307_v11 = vld [vmem:[#allocation11 + $0x4] sm:$0xf]  ;;  %739 = vmatpush.bf16.msra.mxu0 %v1268_v3  ;;  %v1256_v12 = vor.u32 %v1308_v10, %v1255_v9  ;;  %v1257_v13 = vld [vmem:[#allocation11 + $0xc] sm:$0xf0]  ;;  %v1282_v14 = vld [vmem:[#allocation10] sm:$0xf] }
  0x57   : > { %v1314_v15 = vld [vmem:[#allocation10 + $0x4] sm:$0xf0]  ;;  %752 = vmatpush.bf16.msra.mxu1 %v1272_v7  ;;  %v1260_v16 = vor.u32 %v1307_v11, %v1257_v13  ;;  %v1315_v18 = vld [vmem:[#allocation10 + $0x14] sm:$0xf]  ;;  %v1292_v19 = vld [vmem:[#allocation10 + $0x18] sm:$0xf0] }
  0x58   : > { %827 = vmatpush.bf16.msra.mxu3 %v1291_v8  ;;  %v1283_v17 = vor.u32 %v1314_v15, %v1282_v14  ;;  %v1295_v20 = vor.u32 %v1315_v18, %v1292_v19  ;;  %v1313_v21 = vld [vmem:[#allocation10 + $0x4] sm:$0xf]  ;;  %v1284_v22 = vld [vmem:[#allocation10 + $0x8] sm:$0xf0]  ;;  %v1275_v23 = vld [vmem:[#allocation11 + $0x20] sm:$0xf] }
  0x59   : > { %v1312_v24 = vld [vmem:[#allocation11 + $0x28] sm:$0xf0]  ;;  %v1263_v25 = vld [vmem:[#allocation11 + $0x8] sm:$0xf]  ;;  %v688_v26 = vld [vmem:[%s2043_s29] sm:$0xf]  ;;  %v1287_v30 = vor.u32 %v1313_v21, %v1284_v22 }
  0x5a   : > { %740 = vmatpush.bf16.msra.mxu0 %v1256_v12  ;;  %vm729_vm0 = vcmask 261120   ;;  %v1276_v27 = vor.u32 %v1312_v24, %v1275_v23  ;;  %v1309_v28 = vld [vmem:[#allocation11 + $0x10] sm:$0xf0]  ;;  %v895_v32 = vld [vmem:[%s2148_s8] sm:$0xff]  ;;  %v1832_v33 = vmov 0   ;;  %v774_v35 = vld [vmem:[#allocation14] sm:$0xff] }
  0x5b   : > { %753 = vmatpush.bf16.msra.mxu1 %v1260_v16  ;;  %v792_v29 = vld [vmem:[%s2036_s7] sm:$0xf]  ;;  %v1264_v31 = vor.u32 %v1309_v28, %v1263_v25  ;;  %1462 = vset.pattern.permute.xlu0 %v1832_v33  ;;  %v772_v34 = vld [vmem:[#allocation16] sm:$0xff]  ;;  %vm913_vm1 = vcmask 1043456   ;;  %s2186_s16 = sld [smem:[#allocation29_spill]]  ;;  %s1251_s10 = sshll.u32 %s2032_s17, 3 }
  0x5c   : > { %828 = vmatpush.bf16.msra.mxu3 %v1283_v17  ;;  %765 = vmatpush.bf16.msra.mxu2 %v1276_v27  ;;  %v847_v45 = vld [vmem:[#allocation13] sm:$0xff]  ;;  %v849_v48 = vld [vmem:[%s2144_s4] sm:$0xff]  ;;  %s2187_s28 = sld [smem:[#allocation28_spill]]  ;;  %vm907_vm3 = vcmask 64512   ;;  %s662_s20 = scalar_lea.vmem [#allocation18], %s1251_s10 }
  0x5d   : > { %1277 = vmatmul.msk.bf16.vlgmr.msra.gmra.mxu0 %vm729_vm0, %v688_v26  ;;  %898 = vperm.xlu0 %1462, %v895_v32   ;;  %v890_v61 = vld [vmem:[%s2149_s9] sm:$0xff]  ;;  %s2188_s30 = sld [smem:[#allocation41_spill]]  ;;  %s976_s22 = sshll.u32 %s662_s20, 4  ;;  %s977_s22 = int_to_ptr.vmem [resolvable:$true] %s976_s22 }
  0x5e   : > { %840 = vmatpush.bf16.msrb.mxu0 %v1295_v20  ;;  %1278 = vmatmul.msk.bf16.vlgmr.msra.gmra.mxu1 %vm729_vm0, %v688_v26  ;;  %v894_v62 = vmul.f32 -2.3025851, %v890_v61  ;;  %vm893_vm2 = vcmp.ge.f32.partialorder %v890_v61, 0.0  ;;  %s943_s29 = scalar_lea.sflag [#allocation19], %s2032_s17 }
  0x5f   : > { %1296 = vmatmul.msk.bf16.vlgmr.msra.gmra.mxu3 %vm729_vm0, %v792_v29 }
  0x60   : > { %766 = vmatpush.bf16.msra.mxu2 %v1264_v31 }
  0x61   : > { %s1301_s15 = sshll.u32 %s2186_s16, 1 }
  0x62   : > { %841 = vmatpush.bf16.msrb.mxu0 %v1287_v30  ;;  %s954_s3 = sadd.s32 %s2187_s28, %s1301_s15 }
  0x63   : > { %1279 = vmatmul.msk.bf16.vlgmr.msra.gmra.mxu2 %vm729_vm0, %v688_v26  ;;  %s1302_s5 = sshll.u32 %s954_s3, 3  ;;  %s1695_s11 = scalar_lea.hbm %s2188_s30, 32 }
  0x64   : > { %s974_s7 = scalar_lea.hbm %s2188_s30, %s1302_s5 }
  0x65   : > { %s978_s23 = sshll.u32 %s974_s7, 4  ;;  %s979_s23 = int_to_ptr.hbm [resolvable:$true] %s978_s23 }
  0x66   : > { %s1689_s25 = sshra.s32 %s979_s23, 4  ;;  %s1690_s25 = int_to_ptr.hbm [resolvable:$true] %s1689_s25 }
  0x67   : > { %s1691_s14 = scalar_lea.hbm %s1690_s25, 8  ;;  %p1696_p9 = scmp.lt.s32.totalorder %s1690_s25, %s2188_s30 }
  0x68   : > { %p1692_p1 = scmp.ne.s32.totalorder %s1690_s25, %s1691_s14  ;;  %p1697_p10 = scmp.lt.s32.totalorder %s1695_s11, %s1691_s14 }
  0x6a   : > { %p1693_p3 = pnand %p1692_p1, %p2003_p2  ;;  %p1698_p11 = por %p1697_p10, %p1696_p9 }
  0x6c   : > { %p1694_p8 = pneg %p1693_p3 }
  0x6d   : > { %1297 = vmatmul.msk.bf16.vlgmr.msrb.gmra.mxu0 %vm729_vm0, %v792_v29 }
  0x6e   : > { %p1699_p12 = pnand %p1698_p11, %p1694_p8 }
  0xcf   : > { %v899_v63 = vpop.permute.xlu0 %898 }
  0xd0   : > { %v901_v0 = vadd.f32 %v899_v63, %v894_v62 }
  0xd2   : > { %v902_v1 = vmul.f32 1.442695, %v901_v0 }
  0xd4   : > { %1463 = vpow2.f32 %v902_v1 }
  0xda   : > { %v742_v36 = vpop.f32.mrf.mxu0  ;;  %v1464_v2 = vpop.eup %1463 }
  0xdb   : > { %v773_v37 = vmul.f32 %v772_v34, %v742_v36  ;;  %v755_v38 = vpop.f32.mrf.mxu1  ;;  %v904_v3 = vsel %vm893_vm2, %v1464_v2, 0.0 }
  0xdc   : > { %v775_v39 = vmul.f32 %v774_v35, %v755_v38 }
  0xde   : > { %v776_v40 = vsub.f32 %v773_v37, %v775_v39 }
  0xe0   : > { %v777_v41 = vpack.c.bf16 %v776_v40, %v776_v40 }
  0xe2   : > { %v830_v42 = vpop.f32.mrf.mxu3  ;;  %784 = vst [vmem:[#allocation3] sm:$0xf] %v777_v41  ;;  %v744_v43 = vpop.f32.mrf.mxu0 }
  0xe3   : > { %v757_v44 = vpop.f32.mrf.mxu1  ;;  %v848_v49 = vmul.f32 %v847_v45, %v830_v42 }
  0xe6   : > { %v768_v46 = vpop.f32.mrf.mxu2 }
  0xe7   : > { %v778_v47 = vpack.c.bf16 %v768_v46, %v768_v46 }
  0xe9   : > { %v870_v50 = vld [vmem:[#allocation3] sm:$0xf]  ;;  %787 = vst [vmem:[#allocation4] sm:$0xf] %v778_v47 }
  0xea   : > { %v832_v51 = vpop.f32.mrf.mxu3  ;;  %882 = vmatpush.bf16.xpose.msrb.mxu1 %v870_v50  ;;  %v843_v52 = vpop.f32.mrf.mxu0 }
  0xeb   : > { %v850_v53 = vmul.f32 %v849_v48, %v843_v52 }
  0xed   : > { %v851_v54 = vadd.f32 %v850_v53, %v848_v49 }
  0xee   : > { %v770_v55 = vpop.f32.mrf.mxu2 }
  0xef   : > { %v852_v56 = vpack.c.bf16 %v851_v54, %v851_v54 }
  0xf0   : > { %v873_v59 = vld [vmem:[#allocation4] sm:$0xf] }
  0xf1   : > { %853 = vst [vmem:[#allocation2] sm:$0xf] %v852_v56  ;;  %v915_v60 = vsel %vm913_vm1, %v873_v59, 0 }
  0xf2   : > { %v845_v57 = vpop.f32.mrf.mxu0  ;;  %924 = vmatpush.bf16.msrb.mxu2 %v915_v60 }
  0xf8   : > { %v874_v58 = vld [vmem:[#allocation2] sm:$0xf] }
  0xf9   : > { %883 = vmatmul.bf16.vlgmr.msrb.gmra.mxu1 %v874_v58 }
 0x176   : > { %v884_v4 = vpop.f32.mrf.mxu1 }
 0x177   : > { %v905_v5 = vmul.f32 %v904_v3, %v884_v4 }
 0x179   : > { %v906_v6 = vpack.c.bf16 %v905_v5, %v905_v5  ;;  %908 = vst.msk [vmem:[%s662_s20] sm:$0xff] %vm907_vm3, %v905_v5 }
 0x17b   : > { %1298 = vmatmul.msk.bf16.vlgmr.msrb.gmra.mxu2 %vm907_vm3, %v906_v6 }
 0x17e   : > { %v886_v7 = vpop.f32.mrf.mxu1 }
 0x17f   : > { %1702 = shalt.err (!%p1699_p12)
}
 0x180   : > { %1342 = dma.vmem_to_hbm [thread:$0]  (%p2003_p2), %s977_s22, 128, %s979_s23, %s943_s29  }
 0x181   : > { %s2189_s15 = sld [smem:[#allocation40_spill]]  ;;  %s655_s27 = scalar_lea.vmem [#allocation17], %s1251_s10 }
 0x182   : > { %s958_s6 = sshll.u32 %s655_s27, 4  ;;  %s938_s25 = scalar_lea.sflag [#allocation7], %s2032_s17  ;;  %s959_s6 = int_to_ptr.vmem [resolvable:$true] %s958_s6 }
 0x187   : > { %s956_s3 = scalar_lea.hbm %s2189_s15, %s1302_s5  ;;  %s1723_s5 = scalar_lea.hbm %s2189_s15, 32 }
 0x188   : > { %s960_s7 = sshll.u32 %s956_s3, 4  ;;  %s961_s7 = int_to_ptr.hbm [resolvable:$true] %s960_s7 }
 0x189   : > { %s1717_s14 = sshra.s32 %s961_s7, 4  ;;  %s1718_s14 = int_to_ptr.hbm [resolvable:$true] %s1717_s14 }
 0x18a   : > { %s1719_s13 = scalar_lea.hbm %s1718_s14, 8  ;;  %p1724_p6 = scmp.lt.s32.totalorder %s1718_s14, %s2189_s15 }
 0x18b   : > { %p1720_p13 = scmp.ne.s32.totalorder %s1718_s14, %s1719_s13  ;;  %p1725_p7 = scmp.lt.s32.totalorder %s1723_s5, %s1719_s13 }
 0x18d   : > { %p1721_p0 = pnand %p1720_p13, %p2003_p2  ;;  %p1726_p1 = por %p1725_p7, %p1724_p6 }
 0x18f   : > { %p1722_p5 = pneg %p1721_p0 }
 0x191   : > { %p1727_p3 = pnand %p1726_p1, %p1722_p5 }
 0x1fe   : > { %v926_v8 = vpop.f32.mrf.mxu2 }
 0x1ff   : > { %931 = vst [vmem:[%s655_s27] sm:$0xff] %v926_v8 }
 0x200   : > { %1730 = shalt.err (!%p1727_p3)
}
 0x201   : > { %1341 = dma.vmem_to_hbm [thread:$0]  (%p2003_p2), %s959_s6, 128, %s961_s7, %s938_s25  }
 0x206   : > { %v928_v9 = vpop.f32.mrf.mxu2 }
 0x207 PF: > { %s2190_s17 = sld [smem:[#allocation27_spill]]  ;;  %p1386_p8 = scmp.ge.s32.totalorder %s1821_s24, 2 }
 0x209   : > { %p1369_p9 = pnand %p1386_p8, %p2009_p4 }
 0x20b   : > { %p1370_p10 = pneg %p1369_p9 }
 0x20d   : > { %s990_s11 = sand.u32 1, %s2190_s17  }
 0x20e   : > { %s991_s21 = scalar_lea.sflag [#allocation7], %s990_s11 }
 0x20f   : > { %1784 = dma.done.wait (%p1370_p10), %s991_s21, 128  }
 0x210   : > { %1786 = vsyncadd (%p1370_p10), %s991_s21, 4294967168  ;;  %s1001_s16 = scalar_lea.sflag [#allocation19], %s990_s11 }
 0x211   : > { %1788 = dma.done.wait (%p1370_p10), %s1001_s16, 128  }
 0x212   : > { %1790 = vsyncadd (%p1370_p10), %s1001_s16, 4294967168  ;;  %s36_s24 = sadd.s32 1, %s1821_s24   ;;  %s2192_s20 = sld [smem:[#allocation30_spill]] }
 0x213   : > { %p33_p11 = scmp.ge.s32.totalorder %s36_s24, 6   ;;  %s2193_s21 = sld [smem:[#allocation31_spill]] }
 0x214   : > { %s2194_s22 = sld [smem:[#allocation32_spill]]  ;;  %s2196_s17 = smov %s1797_s18 }
 0x215   : > { %s2195_s23 = sld [smem:[#allocation33_spill]]  ;;  %s2197_s18 = smov %s1801_s19 }
 0x216   : > { %s2198_s19 = smov %s2016_s26  ;;  %35 = sbr.rel (!%p33_p11) target bundleno = 21 (0x15), region = 184 }
 0x21b   :  { %1007 = vsyncpa [#allocation6], 1 }
 0x21c   :  { %1009 = vsyncpa [#allocation6 + $0x1], 1 }
 0x21d   :  { %1010 = vsyncpa [#allocation9], 1 }
 0x21e   :  { %1012 = vsyncpa [#allocation9 + $0x1], 1 }
 0x21f   :  { %1013 = vsyncpa [#allocation12], 1 }
 0x220   :  { %1014 = vsyncpa [#allocation15], 1 }
 0x221   :  { %1015 = vsyncpa [#allocation7], 1 }
 0x222   :  { %1017 = vsyncpa [#allocation7 + $0x1], 1 }
 0x223   :  { %1018 = vsyncpa [#allocation19], 1 }
 0x224   :  { %1020 = vsyncpa [#allocation19 + $0x1], 1 }

// kernel: tpu_custom_call.1
= control target key start
LH: loop header
LB: loop body
LE: loop exit
PB: predicated region body
PF: predicated region fallthrough
CT: control target
= control target key end

     0   :  { %s2140_s0 = inlined_call_operand.hbm [shape: bf16[2,2,8,32], index: 0, kind: input, shape index: {}]   ;;  %s2141_s1 = inlined_call_operand.hbm [shape: bf16[2,2,8,32], index: 1, kind: input, shape index: {}]   ;;  %s2142_s2 = inlined_call_operand.hbm [shape: bf16[32,256], index: 2, kind: input, shape index: {}]   ;;  %s2143_s3 = inlined_call_operand.hbm [shape: bf16[32,384], index: 3, kind: input, shape index: {}]   ;;  %s2144_s4 = inlined_call_operand.vmem [shape: f32[8,128], index: 4, kind: input, shape index: {}]   ;;  %s2145_s5 = inlined_call_operand.hbm [shape: f32[8,128], index: 5, kind: input, shape index: {}]   ;;  %s2146_s6 = inlined_call_operand.hbm [shape: f32[8,128], index: 6, kind: input, shape index: {}]   ;;  %s2147_s7 = inlined_call_operand.hbm [shape: f32[8,128], index: 7, kind: input, shape index: {}]   ;;  %s2148_s8 = inlined_call_operand.vmem [shape: f32[8,1], index: 8, kind: input, shape index: {}]   ;;  %s2149_s9 = inlined_call_operand.vmem [shape: f32[8,8], index: 9, kind: input, shape index: {}]   ;;  %s2150_s10 = inlined_call_operand.hbm [shape: f32[2,2,8,128], index: 10, kind: output, shape index: {0}]   ;;  %s2151_s11 = inlined_call_operand.hbm [shape: f32[2,2,8,8], index: 11, kind: output, shape index: {1}]  }
   0x1   :  { %2160 = sst [smem:[#allocation35_spill]] %s2142_s2 }
   0x2   :  { %2161 = sst [smem:[#allocation36_spill]] %s2143_s3 }
   0x3   :  { %2162 = sst [smem:[#allocation37_spill]] %s2145_s5 }
   0x4   :  { %2163 = sst [smem:[#allocation38_spill]] %s2146_s6 }
   0x5   :  { %2164 = sst [smem:[#allocation39_spill]] %s2147_s7 }
   0x6   :  { %2165 = sst [smem:[#allocation40_spill]] %s2150_s10 }
   0x7   :  { %2166 = sst [smem:[#allocation41_spill]] %s2151_s11 }
   0x8   :  { %17 = vsyncpa [#allocation6], 0 }
   0x9   :  { %19 = vsyncpa [#allocation6 + $0x1], 0 }
   0xa   :  { %20 = vsyncpa [#allocation9], 0 }
   0xb   :  { %22 = vsyncpa [#allocation9 + $0x1], 0 }
   0xc   :  { %23 = vsyncpa [#allocation12], 0 }
   0xd   :  { %24 = vsyncpa [#allocation15], 0 }
   0xe   :  { %25 = vsyncpa [#allocation7], 0 }
   0xf   :  { %27 = vsyncpa [#allocation7 + $0x1], 0 }
  0x10   :  { %28 = vsyncpa [#allocation19], 0 }
  0x11   :  { %30 = vsyncpa [#allocation19 + $0x1], 0  ;;  %s1893_s17 = smov 0   ;;  %s1895_s18 = smov 0  }
  0x12   :  { %s1897_s19 = smov 0   ;;  %s1899_s20 = smov 0  }
  0x13   :  { %s1901_s21 = smov 0   ;;  %s1903_s22 = smov 0  }
  0x14   :  { %s1905_s23 = smov 0   ;;  %s1907_s24 = smov 0  }
  0x15 LB: > { %2167 = sst [smem:[#allocation27_spill]] %s1793_s17  ;;  %s1934_s25 = sadd.s32 4294967295, %s1821_s24   ;;  %s1821_s24 = sphi %s1907_s24, %s36_s24   ;;  %s1817_s23 = sphi %s1905_s23, %s2195_s23   ;;  %s1813_s22 = sphi %s1903_s22, %s2194_s22   ;;  %s1809_s21 = sphi %s1901_s21, %s2193_s21   ;;  %s1805_s20 = sphi %s1899_s20, %s2192_s20   ;;  %s1801_s19 = sphi %s1897_s19, %s2198_s19   ;;  %s1797_s18 = sphi %s1895_s18, %s2197_s18   ;;  %s1793_s17 = sphi %s1893_s17, %s2196_s17  }
  0x16   : > { %2168 = sst [smem:[#allocation28_spill]] %s1805_s20  ;;  %p1228_p0 = scmp.ge.s32.totalorder %s1821_s24, 1 }
  0x17   : > { %2169 = sst [smem:[#allocation29_spill]] %s1809_s21  ;;  %p87_p1 = scmp.eq.s32.totalorder %s1934_s25, 0 }
  0x18   : > { %2170 = sst [smem:[#allocation30_spill]] %s1813_s22  ;;  %p406_p2 = scmp.lt.s32.totalorder %s1821_s24, 5 }
  0x19   : > { %2171 = sst [smem:[#allocation31_spill]] %s1817_s23  ;;  %s1823_s30 = smov [#allocation10]  }
  0x1a   : > { %s2172_s2 = sld [smem:[#allocation35_spill]]  ;;  %p1942_p3 = pnand %p1228_p0, %p406_p2 }
  0x1b   : > { %s419_s12 = sshll.u32 %s1823_s30, 4  ;;  %s2175_s3 = sld [smem:[#allocation36_spill]]  ;;  %s420_s12 = int_to_ptr.vmem [resolvable:$true] %s419_s12 }
  0x1c   : > { %p1345_p4 = pneg %p1942_p3  ;;  %s1824_s26 = smov 128  }
  0x1d   : > { %s1825_s27 = smov 8   ;;  %s1827_s10 = smov 192  }
  0x1e   : > { %p1950_p5 = pnand %p1345_p4, %p87_p1  ;;  %s1828_s11 = smov 12  }
  0x1f   : > { %s2176_s6 = sld [smem:[#allocation38_spill]]  ;;  %s1829_s15 = smov [#allocation14]  }
  0x20   : > { %s417_s28 = sshll.u32 %s2172_s2, 4  ;;  %s1826_s2 = smov [#allocation11]   ;;  %s418_s28 = int_to_ptr.hbm [resolvable:$true] %s417_s28 }
  0x21   : > { %s431_s16 = sshll.u32 %s2175_s3, 4  ;;  %s433_s30 = sshll.u32 %s1826_s2, 4  ;;  %s432_s16 = int_to_ptr.hbm [resolvable:$true] %s431_s16  ;;  %s434_s30 = int_to_ptr.vmem [resolvable:$true] %s433_s30 }
  0x22   : > { %1348 = dma.hbm_to_vmem [thread:$0]  (!%p1950_p5), %s418_s28, 512, %s420_s12, [#allocation9], %s1824_s26, %s1824_s26, %s1825_s27  }
  0x23   : > { %1351 = dma.hbm_to_vmem [thread:$0]  (!%p1950_p5), %s432_s16, 768, %s434_s30, [#allocation12], %s1827_s10, %s1827_s10, %s1828_s11  }
  0x24   : > { %s475_s3 = sshll.u32 %s1829_s15, 4  ;;  %s2177_s5 = sld [smem:[#allocation37_spill]]  ;;  %s476_s3 = int_to_ptr.vmem [resolvable:$true] %s475_s3 }
  0x25   : > { %s473_s14 = sshll.u32 %s2176_s6, 4  ;;  %s1830_s10 = smov [#allocation13]   ;;  %s474_s14 = int_to_ptr.hbm [resolvable:$true] %s473_s14 }
  0x26   : > { %1357 = dma.hbm_to_vmem [thread:$0]  (!%p1950_p5), %s474_s14, 128, %s476_s3, [#allocation15]  }
  0x27   : > { %s457_s11 = sshll.u32 %s1830_s10, 4  ;;  %s2178_s7 = sld [smem:[#allocation39_spill]]  ;;  %s458_s11 = int_to_ptr.vmem [resolvable:$true] %s457_s11 }
  0x28   : > { %s1831_s26 = smov [#allocation16]   ;;  %s1227_s27 = sadd.s32 4294967294, %s1821_s24  }
  0x29   : > { %s493_s3 = sshll.u32 %s1831_s26, 4  ;;  %s58_s30 = sadd.s32 1, %s1813_s22  ;;  %s494_s3 = int_to_ptr.vmem [resolvable:$true] %s493_s3 }
  0x2a   : > { %s455_s2 = sshll.u32 %s2177_s5, 4  ;;  %s62_s14 = sadd.s32 1, %s1817_s23  ;;  %s456_s2 = int_to_ptr.hbm [resolvable:$true] %s455_s2 }
  0x2b   : > { %1354 = dma.hbm_to_vmem [thread:$0]  (!%p1950_p5), %s456_s2, 128, %s458_s11, [#allocation12]  }
  0x2c   : > { %p60_p6 = scmp.ge.s32.totalorder %s58_s30, 2  ;;  %s73_s15 = sadd.s32 1, %s1801_s19 }
  0x2d   : > { %s491_s16 = sshll.u32 %s2178_s7, 4  ;;  %p80_p7 = scmp.ne.s32.totalorder %s1801_s19, %s1797_s18  ;;  %s492_s16 = int_to_ptr.hbm [resolvable:$true] %s491_s16 }
  0x2e   : > { %1360 = dma.hbm_to_vmem [thread:$0]  (!%p1950_p5), %s492_s16, 128, %s494_s3, [#allocation15]  }
  0x2f   : > { %p81_p8 = scmp.eq.s32.totalorder %s1821_s24, 0  ;;  %s2200_s30 = smov (%p60_p6, %s58_s30), 0 }
  0x30   : > { %2179 = sst [smem:[#allocation32_spill]] %s2200_s30  ;;  %s2202_s14 = smov (!%p60_p6, %s62_s14), %s1817_s23 }
  0x31   : > { %s67_s28 = ssub.s32 %s1813_s22, %s2200_s30  ;;  %p1988_p9 = por %p81_p8, %p80_p7 }
  0x32   : > { %p64_p10 = scmp.ge.s32.totalorder %s2202_s14, 2  ;;  %p86_p11 = scmp.ne.s32.totalorder %s1797_s18, %s1793_s17 }
  0x33   : > { %p361_p12 = scmp.eq.s32.totalorder %s1934_s25, 3  ;;  %p367_p13 = scmp.eq.s32.totalorder %s1227_s27, 3 }
  0x34   : > { %s2204_s14 = smov (%p64_p10, %s2202_s14), 0  ;;  %p1999_p0 = por %p87_p1, %p86_p11 }
  0x35   : > { %2181 = sst [smem:[#allocation33_spill]] %s2204_s14  ;;  %p2003_p2 = por %p361_p12, %p80_p7 }
  0x36   : > { %s66_s10 = ssub.s32 %s1817_s23, %s2204_s14  ;;  %p2009_p4 = por %p367_p13, %p86_p11 }
  0x37   : > { %s68_s20 = sor.u32 %s67_s28, %s66_s10  ;;  %p1380_p5 = scmp.lt.s32.totalorder %s1821_s24, 4 }
  0x38   : > { %s2184_s11 = scalar_select %p2009_p4, 1, 0 }
  0x39   : > { %p71_p6 = scmp.eq.s32.totalorder %s68_s20, 0  ;;  %s514_s21 = sand.u32 1, %s1801_s19  }
  0x3a   : > { %2185 = sst [smem:[#allocation34_spill]] %s2184_s11  ;;  %s1237_s16 = sshll.u32 %s514_s21, 2 }
  0x3b   : > { %s2016_s26 = scalar_select %p71_p6, %s1801_s19, %s73_s15  }
  0x3c   : > { %s1238_s3 = sshll.u32 %s1817_s23, 1  ;;  %s518_s5 = scalar_lea.vmem [#allocation5], %s1237_s16 }
  0x3d   : > { %s523_s27 = sadd.s32 %s1813_s22, %s1238_s3  ;;  %s529_s6 = sshll.u32 %s518_s5, 4  ;;  %s530_s6 = int_to_ptr.vmem [resolvable:$true] %s529_s6 }
  0x3e   : > { %s1239_s7 = sshll.u32 %s523_s27, 2  ;;  %p1362_p7 = pnand %p1380_p5, %p1988_p9 }
  0x3f   : > { %s525_s17 = scalar_lea.hbm %s2140_s0, %s1239_s7  ;;  %s515_s10 = scalar_lea.sflag [#allocation6], %s514_s21 }
  0x40   : > { %s527_s28 = sshll.u32 %s525_s17, 4  ;;  %s551_s15 = scalar_lea.hbm %s2141_s1, %s1239_s7  ;;  %s528_s28 = int_to_ptr.hbm [resolvable:$true] %s527_s28 }
  0x41   : > { %1364 = dma.hbm_to_vmem [thread:$0]  (!%p1362_p7), %s528_s28, 64, %s530_s6, %s515_s10  }
  0x42   : > { %s536_s23 = sand.u32 1, %s1821_s24   ;;  %s553_s3 = sshll.u32 %s551_s15, 4  ;;  %s554_s3 = int_to_ptr.hbm [resolvable:$true] %s553_s3 }
  0x43   : > { %s540_s5 = scalar_lea.vmem [#allocation8], %s1237_s16  ;;  %s537_s22 = scalar_lea.sflag [#allocation9], %s536_s23 }
  0x44   : > { %s555_s27 = sshll.u32 %s540_s5, 4  ;;  %564 = sbr.rel (%p1942_p3) target bundleno = 519 (0x207), region = 60  ;;  %s556_s27 = int_to_ptr.vmem [resolvable:$true] %s555_s27 }
  0x45   : > { %1367 = dma.hbm_to_vmem [thread:$0]  (!%p1362_p7), %s554_s3, 64, %s556_s27, %s537_s22  }
  0x46   : > { %s2032_s17 = sand.u32 (!%p1942_p3), 1, %s1797_s18  }
  0x47   : > { %s1244_s6 = sshll.u32 (!%p1942_p3), %s2032_s17, 2  ;;  %s567_s30 = scalar_lea.sflag (!%p1942_p3), [#allocation6], %s2032_s17 }
  0x48   : > { %s2036_s7 = scalar_lea.vmem (!%p1942_p3), [#allocation5], %s1244_s6 }
  0x49   : > { %1764 = dma.done.wait (%p1999_p0), %s567_s30, 64  }
  0x4a   : > { %1766 = vsyncadd (%p1999_p0), %s567_s30, 4294967232  ;;  %s576_s22 = sand.u32 1, %s1934_s25   ;;  %s2043_s29 = scalar_lea.vmem [#allocation8], %s1244_s6 }
  0x4b   : > { %s577_s23 = scalar_lea.sflag [#allocation9], %s576_s22 }
  0x4c   : > { %1768 = dma.done.wait (%p1999_p0), %s577_s23, 64  }
  0x4d   : > { %1770 = vsyncadd (%p1999_p0), %s577_s23, 4294967232 }
  0x4e   : > { %1772 = dma.done.wait (%p87_p1), [#allocation9], 512  }
  0x4f   : > { %1774 = vsyncadd (%p87_p1), [#allocation9], 4294966784 }
  0x50   : > { %1776 = dma.done.wait (%p87_p1), [#allocation12], 896  }
  0x51   : > { %1778 = vsyncadd (%p87_p1), [#allocation12], 4294966400 }
  0x52   : > { %1780 = dma.done.wait (%p87_p1), [#allocation15], 256  }
  0x53   : > { %1782 = vsyncadd (%p87_p1), [#allocation15], 4294967040  ;;  %v1267_v0 = vld [vmem:[#allocation11 + $0x18] sm:$0xf]  ;;  %v1311_v1 = vld [vmem:[#allocation11 + $0x20] sm:$0xf0] }
  0x54   : > { %v1310_v2 = vld [vmem:[#allocation11 + $0x1c] sm:$0xf]  ;;  %v1268_v3 = vor.u32 %v1311_v1, %v1267_v0  ;;  %v1269_v4 = vld [vmem:[#allocation11 + $0x24] sm:$0xf0]  ;;  %v1290_v5 = vld [vmem:[#allocation10 + $0x10] sm:$0xf] }
  0x55   : > { %v1316_v6 = vld [vmem:[#allocation10 + $0x14] sm:$0xf0]  ;;  %v1272_v7 = vor.u32 %v1310_v2, %v1269_v4  ;;  %v1255_v9 = vld [vmem:[#allocation11] sm:$0xf]  ;;  %v1308_v10 = vld [vmem:[#allocation11 + $0x8] sm:$0xf0] }
  0x56   : > { %v1291_v8 = vor.u32 %v1316_v6, %v1290_v5  ;;  %v1307_v11 = vld [vmem:[#allocation11 + $0x4] sm:$0xf]  ;;  %739 = vmatpush.bf16.msra.mxu0 %v1268_v3  ;;  %v1256_v12 = vor.u32 %v1308_v10, %v1255_v9  ;;  %v1257_v13 = vld [vmem:[#allocation11 + $0xc] sm:$0xf0]  ;;  %v1282_v14 = vld [vmem:[#allocation10] sm:$0xf] }
  0x57   : > { %v1314_v15 = vld [vmem:[#allocation10 + $0x4] sm:$0xf0]  ;;  %752 = vmatpush.bf16.msra.mxu1 %v1272_v7  ;;  %v1260_v16 = vor.u32 %v1307_v11, %v1257_v13  ;;  %v1315_v18 = vld [vmem:[#allocation10 + $0x14] sm:$0xf]  ;;  %v1292_v19 = vld [vmem:[#allocation10 + $0x18] sm:$0xf0] }
  0x58   : > { %827 = vmatpush.bf16.msra.mxu3 %v1291_v8  ;;  %v1283_v17 = vor.u32 %v1314_v15, %v1282_v14  ;;  %v1295_v20 = vor.u32 %v1315_v18, %v1292_v19  ;;  %v1313_v21 = vld [vmem:[#allocation10 + $0x4] sm:$0xf]  ;;  %v1284_v22 = vld [vmem:[#allocation10 + $0x8] sm:$0xf0]  ;;  %v1275_v23 = vld [vmem:[#allocation11 + $0x20] sm:$0xf] }
  0x59   : > { %v1312_v24 = vld [vmem:[#allocation11 + $0x28] sm:$0xf0]  ;;  %v1263_v25 = vld [vmem:[#allocation11 + $0x8] sm:$0xf]  ;;  %v688_v26 = vld [vmem:[%s2043_s29] sm:$0xf]  ;;  %v1287_v30 = vor.u32 %v1313_v21, %v1284_v22 }
  0x5a   : > { %740 = vmatpush.bf16.msra.mxu0 %v1256_v12  ;;  %vm729_vm0 = vcmask 261120   ;;  %v1276_v27 = vor.u32 %v1312_v24, %v1275_v23  ;;  %v1309_v28 = vld [vmem:[#allocation11 + $0x10] sm:$0xf0]  ;;  %v895_v32 = vld [vmem:[%s2148_s8] sm:$0xff]  ;;  %v1832_v33 = vmov 0   ;;  %v774_v35 = vld [vmem:[#allocation14] sm:$0xff] }
  0x5b   : > { %753 = vmatpush.bf16.msra.mxu1 %v1260_v16  ;;  %v792_v29 = vld [vmem:[%s2036_s7] sm:$0xf]  ;;  %v1264_v31 = vor.u32 %v1309_v28, %v1263_v25  ;;  %1462 = vset.pattern.permute.xlu0 %v1832_v33  ;;  %v772_v34 = vld [vmem:[#allocation16] sm:$0xff]  ;;  %vm913_vm1 = vcmask 1043456   ;;  %s2186_s16 = sld [smem:[#allocation29_spill]]  ;;  %s1251_s10 = sshll.u32 %s2032_s17, 3 }
  0x5c   : > { %828 = vmatpush.bf16.msra.mxu3 %v1283_v17  ;;  %765 = vmatpush.bf16.msra.mxu2 %v1276_v27  ;;  %v847_v45 = vld [vmem:[#allocation13] sm:$0xff]  ;;  %v849_v48 = vld [vmem:[%s2144_s4] sm:$0xff]  ;;  %s2187_s28 = sld [smem:[#allocation28_spill]]  ;;  %vm907_vm3 = vcmask 64512   ;;  %s662_s20 = scalar_lea.vmem [#allocation18], %s1251_s10 }
  0x5d   : > { %1277 = vmatmul.msk.bf16.vlgmr.msra.gmra.mxu0 %vm729_vm0, %v688_v26  ;;  %898 = vperm.xlu0 %1462, %v895_v32   ;;  %v890_v61 = vld [vmem:[%s2149_s9] sm:$0xff]  ;;  %s2188_s30 = sld [smem:[#allocation41_spill]]  ;;  %s976_s22 = sshll.u32 %s662_s20, 4  ;;  %s977_s22 = int_to_ptr.vmem [resolvable:$true] %s976_s22 }
  0x5e   : > { %840 = vmatpush.bf16.msrb.mxu0 %v1295_v20  ;;  %1278 = vmatmul.msk.bf16.vlgmr.msra.gmra.mxu1 %vm729_vm0, %v688_v26  ;;  %v894_v62 = vmul.f32 -2.3025851, %v890_v61  ;;  %vm893_vm2 = vcmp.ge.f32.partialorder %v890_v61, 0.0  ;;  %s943_s29 = scalar_lea.sflag [#allocation19], %s2032_s17 }
  0x5f   : > { %1296 = vmatmul.msk.bf16.vlgmr.msra.gmra.mxu3 %vm729_vm0, %v792_v29 }
  0x60   : > { %766 = vmatpush.bf16.msra.mxu2 %v1264_v31 }
  0x61   : > { %s1301_s15 = sshll.u32 %s2186_s16, 1 }
  0x62   : > { %841 = vmatpush.bf16.msrb.mxu0 %v1287_v30  ;;  %s954_s3 = sadd.s32 %s2187_s28, %s1301_s15 }
  0x63   : > { %1279 = vmatmul.msk.bf16.vlgmr.msra.gmra.mxu2 %vm729_vm0, %v688_v26  ;;  %s1302_s5 = sshll.u32 %s954_s3, 3  ;;  %s1695_s11 = scalar_lea.hbm %s2188_s30, 32 }
  0x64   : > { %s974_s7 = scalar_lea.hbm %s2188_s30, %s1302_s5 }
  0x65   : > { %s978_s23 = sshll.u32 %s974_s7, 4  ;;  %s979_s23 = int_to_ptr.hbm [resolvable:$true] %s978_s23 }
  0x66   : > { %s1689_s25 = sshra.s32 %s979_s23, 4  ;;  %s1690_s25 = int_to_ptr.hbm [resolvable:$true] %s1689_s25 }
  0x67   : > { %s1691_s14 = scalar_lea.hbm %s1690_s25, 8  ;;  %p1696_p9 = scmp.lt.s32.totalorder %s1690_s25, %s2188_s30 }
  0x68   : > { %p1692_p1 = scmp.ne.s32.totalorder %s1690_s25, %s1691_s14  ;;  %p1697_p10 = scmp.lt.s32.totalorder %s1695_s11, %s1691_s14 }
  0x6a   : > { %p1693_p3 = pnand %p1692_p1, %p2003_p2  ;;  %p1698_p11 = por %p1697_p10, %p1696_p9 }
  0x6c   : > { %p1694_p8 = pneg %p1693_p3 }
  0x6d   : > { %1297 = vmatmul.msk.bf16.vlgmr.msrb.gmra.mxu0 %vm729_vm0, %v792_v29 }
  0x6e   : > { %p1699_p12 = pnand %p1698_p11, %p1694_p8 }
  0xcf   : > { %v899_v63 = vpop.permute.xlu0 %898 }
  0xd0   : > { %v901_v0 = vadd.f32 %v899_v63, %v894_v62 }
  0xd2   : > { %v902_v1 = vmul.f32 1.442695, %v901_v0 }
  0xd4   : > { %1463 = vpow2.f32 %v902_v1 }
  0xda   : > { %v742_v36 = vpop.f32.mrf.mxu0  ;;  %v1464_v2 = vpop.eup %1463 }
  0xdb   : > { %v773_v37 = vmul.f32 %v772_v34, %v742_v36  ;;  %v755_v38 = vpop.f32.mrf.mxu1  ;;  %v904_v3 = vsel %vm893_vm2, %v1464_v2, 0.0 }
  0xdc   : > { %v775_v39 = vmul.f32 %v774_v35, %v755_v38 }
  0xde   : > { %v776_v40 = vsub.f32 %v773_v37, %v775_v39 }
  0xe0   : > { %v777_v41 = vpack.c.bf16 %v776_v40, %v776_v40 }
  0xe2   : > { %v830_v42 = vpop.f32.mrf.mxu3  ;;  %784 = vst [vmem:[#allocation3] sm:$0xf] %v777_v41  ;;  %v744_v43 = vpop.f32.mrf.mxu0 }
  0xe3   : > { %v757_v44 = vpop.f32.mrf.mxu1  ;;  %v848_v49 = vmul.f32 %v847_v45, %v830_v42 }
  0xe6   : > { %v768_v46 = vpop.f32.mrf.mxu2 }
  0xe7   : > { %v778_v47 = vpack.c.bf16 %v768_v46, %v768_v46 }
  0xe9   : > { %v870_v50 = vld [vmem:[#allocation3] sm:$0xf]  ;;  %787 = vst [vmem:[#allocation4] sm:$0xf] %v778_v47 }
  0xea   : > { %v832_v51 = vpop.f32.mrf.mxu3  ;;  %882 = vmatpush.bf16.xpose.msrb.mxu1 %v870_v50  ;;  %v843_v52 = vpop.f32.mrf.mxu0 }
  0xeb   : > { %v850_v53 = vmul.f32 %v849_v48, %v843_v52 }
  0xed   : > { %v851_v54 = vadd.f32 %v850_v53, %v848_v49 }
  0xee   : > { %v770_v55 = vpop.f32.mrf.mxu2 }
  0xef   : > { %v852_v56 = vpack.c.bf16 %v851_v54, %v851_v54 }
  0xf0   : > { %v873_v59 = vld [vmem:[#allocation4] sm:$0xf] }
  0xf1   : > { %853 = vst [vmem:[#allocation2] sm:$0xf] %v852_v56  ;;  %v915_v60 = vsel %vm913_vm1, %v873_v59, 0 }
  0xf2   : > { %v845_v57 = vpop.f32.mrf.mxu0  ;;  %924 = vmatpush.bf16.msrb.mxu2 %v915_v60 }
  0xf8   : > { %v874_v58 = vld [vmem:[#allocation2] sm:$0xf] }
  0xf9   : > { %883 = vmatmul.bf16.vlgmr.msrb.gmra.mxu1 %v874_v58 }
 0x176   : > { %v884_v4 = vpop.f32.mrf.mxu1 }
 0x177   : > { %v905_v5 = vmul.f32 %v904_v3, %v884_v4 }
 0x179   : > { %v906_v6 = vpack.c.bf16 %v905_v5, %v905_v5  ;;  %908 = vst.msk [vmem:[%s662_s20] sm:$0xff] %vm907_vm3, %v905_v5 }
 0x17b   : > { %1298 = vmatmul.msk.bf16.vlgmr.msrb.gmra.mxu2 %vm907_vm3, %v906_v6 }
 0x17e   : > { %v886_v7 = vpop.f32.mrf.mxu1 }
 0x17f   : > { %1702 = shalt.err (!%p1699_p12)
}
 0x180   : > { %1342 = dma.vmem_to_hbm [thread:$0]  (%p2003_p2), %s977_s22, 128, %s979_s23, %s943_s29  }
 0x181   : > { %s2189_s15 = sld [smem:[#allocation40_spill]]  ;;  %s655_s27 = scalar_lea.vmem [#allocation17], %s1251_s10 }
 0x182   : > { %s958_s6 = sshll.u32 %s655_s27, 4  ;;  %s938_s25 = scalar_lea.sflag [#allocation7], %s2032_s17  ;;  %s959_s6 = int_to_ptr.vmem [resolvable:$true] %s958_s6 }
 0x187   : > { %s956_s3 = scalar_lea.hbm %s2189_s15, %s1302_s5  ;;  %s1723_s5 = scalar_lea.hbm %s2189_s15, 32 }
 0x188   : > { %s960_s7 = sshll.u32 %s956_s3, 4  ;;  %s961_s7 = int_to_ptr.hbm [resolvable:$true] %s960_s7 }
 0x189   : > { %s1717_s14 = sshra.s32 %s961_s7, 4  ;;  %s1718_s14 = int_to_ptr.hbm [resolvable:$true] %s1717_s14 }
 0x18a   : > { %s1719_s13 = scalar_lea.hbm %s1718_s14, 8  ;;  %p1724_p6 = scmp.lt.s32.totalorder %s1718_s14, %s2189_s15 }
 0x18b   : > { %p1720_p13 = scmp.ne.s32.totalorder %s1718_s14, %s1719_s13  ;;  %p1725_p7 = scmp.lt.s32.totalorder %s1723_s5, %s1719_s13 }
 0x18d   : > { %p1721_p0 = pnand %p1720_p13, %p2003_p2  ;;  %p1726_p1 = por %p1725_p7, %p1724_p6 }
 0x18f   : > { %p1722_p5 = pneg %p1721_p0 }
 0x191   : > { %p1727_p3 = pnand %p1726_p1, %p1722_p5 }
 0x1fe   : > { %v926_v8 = vpop.f32.mrf.mxu2 }
 0x1ff   : > { %931 = vst [vmem:[%s655_s27] sm:$0xff] %v926_v8 }
 0x200   : > { %1730 = shalt.err (!%p1727_p3)
}
 0x201   : > { %1341 = dma.vmem_to_hbm [thread:$0]  (%p2003_p2), %s959_s6, 128, %s961_s7, %s938_s25  }
 0x206   : > { %v928_v9 = vpop.f32.mrf.mxu2 }
 0x207 PF: > { %s2190_s17 = sld [smem:[#allocation27_spill]]  ;;  %p1386_p8 = scmp.ge.s32.totalorder %s1821_s24, 2 }
 0x209   : > { %p1369_p9 = pnand %p1386_p8, %p2009_p4 }
 0x20b   : > { %p1370_p10 = pneg %p1369_p9 }
 0x20d   : > { %s990_s11 = sand.u32 1, %s2190_s17  }
 0x20e   : > { %s991_s21 = scalar_lea.sflag [#allocation7], %s990_s11 }
 0x20f   : > { %1784 = dma.done.wait (%p1370_p10), %s991_s21, 128  }
 0x210   : > { %1786 = vsyncadd (%p1370_p10), %s991_s21, 4294967168  ;;  %s1001_s16 = scalar_lea.sflag [#allocation19], %s990_s11 }
 0x211   : > { %1788 = dma.done.wait (%p1370_p10), %s1001_s16, 128  }
 0x212   : > { %1790 = vsyncadd (%p1370_p10), %s1001_s16, 4294967168  ;;  %s36_s24 = sadd.s32 1, %s1821_s24   ;;  %s2192_s20 = sld [smem:[#allocation30_spill]] }
 0x213   : > { %p33_p11 = scmp.ge.s32.totalorder %s36_s24, 6   ;;  %s2193_s21 = sld [smem:[#allocation31_spill]] }
 0x214   : > { %s2194_s22 = sld [smem:[#allocation32_spill]]  ;;  %s2196_s17 = smov %s1797_s18 }
 0x215   : > { %s2195_s23 = sld [smem:[#allocation33_spill]]  ;;  %s2197_s18 = smov %s1801_s19 }
 0x216   : > { %s2198_s19 = smov %s2016_s26  ;;  %35 = sbr.rel (!%p33_p11) target bundleno = 21 (0x15), region = 184 }
 0x21b   :  { %1007 = vsyncpa [#allocation6], 1 }
 0x21c   :  { %1009 = vsyncpa [#allocation6 + $0x1], 1 }
 0x21d   :  { %1010 = vsyncpa [#allocation9], 1 }
 0x21e   :  { %1012 = vsyncpa [#allocation9 + $0x1], 1 }
 0x21f   :  { %1013 = vsyncpa [#allocation12], 1 }
 0x220   :  { %1014 = vsyncpa [#allocation15], 1 }
 0x221   :  { %1015 = vsyncpa [#allocation7], 1 }
 0x222   :  { %1017 = vsyncpa [#allocation7 + $0x1], 1 }
 0x223   :  { %1018 = vsyncpa [#allocation19], 1 }
 0x224   :  { %1020 = vsyncpa [#allocation19 + $0x1], 1 }

</bundles_post_ra>
